<compile_context>
chip_gen: v7x
topology: tpu7x:2x2x1
jax: 0.10.0
libtpu: 0.0.40
codegen_flags: <defaults>
</compile_context>

<pallas_src>
import functools

import jax
import jax.numpy as jnp
from jax.experimental import pallas as pl
from jax.experimental.pallas import tpu as pltpu

BN_EPS = 1e-5
LANE = 128


def _round_up(v, m):
    return ((v + m - 1) // m) * m


def _default_tiles():
    """(tile_i, tile_j, vmem_limit_bytes) chosen per TPU generation."""
    try:
        kind = jax.devices()[0].device_kind.lower()
    except Exception:  # pragma: no cover
        kind = ""
    if "v5" in kind or "v6" in kind:
        # 128 MiB VMEM: big streaming tiles to sit on the HBM roofline plateau.
        return 1024, 2048, 96 * 1024 * 1024
    # v7x (64 MiB VMEM) and unknown chips: conservative; tile_i=512 keeps >=2
    # "parallel" i-tiles for the two TensorCores once N_pad >= 1024.
    return 512, 1024, 32 * 1024 * 1024


# ----------------------------------------------------------------------------
# Kernel: one RGCN layer (BN folded, weights already applied on the xw side).
#   grid = (i: dest-node tiles ["parallel"], j: source-node tiles ["arbitrary"])
#   acc_ref (VMEM f32 scratch) accumulates the i-tile across all j tiles.
# ----------------------------------------------------------------------------
def _rgcn_layer_kernel(adj_ref, xw_ref, root_ref, out_ref, acc_ref, *,
                       final, num_valid_out):
    j = pl.program_id(1)
    last = pl.num_programs(1) - 1

    # Single bf16 x bf16 MXU matmul per grid cell, K = R * tile_j (relations are
    # folded into the contraction axis), f32 accumulation.
    contrib = jnp.dot(adj_ref[...], xw_ref[...],
                      preferred_element_type=jnp.float32)

    @pl.when(j == 0)
    def _init():
        # Root/self transform + folded-BN bias precomputed once per layer;
        # seeds the accumulator (no diagonal-tile special case needed).
        acc_ref[...] = root_ref[...] + contrib

    @pl.when(j > 0)
    def _accum():
        acc_ref[...] += contrib           # one RMW of acc per grid step

    @pl.when(j == last)
    def _finalize():
        o = jnp.maximum(acc_ref[...], 0.0)            # ReLU (dropout = identity)
        if final:
            # Mask padded class lanes before the log_softmax reductions.
            lane = jax.lax.broadcasted_iota(jnp.int32, o.shape, 1)
            o = jnp.where(lane < num_valid_out, o, -1e30)
            z = o - jnp.max(o, axis=1, keepdims=True)
            lse = jnp.log(jnp.sum(jnp.exp(z), axis=1, keepdims=True))
            o = z - lse
        out_ref[...] = o.astype(out_ref.dtype)


def _rgcn_layer(adj_fold, xw_stack, root, *, num_rel, tile_i, tile_j,
                final, num_valid_out, out_dtype, vmem_limit):
    n_pad, d_pad = root.shape
    grid = (n_pad // tile_i, n_pad // tile_j)

    kernel = functools.partial(_rgcn_layer_kernel,
                               final=final, num_valid_out=num_valid_out)

    return pl.pallas_call(
        kernel,
        out_shape=jax.ShapeDtypeStruct((n_pad, d_pad), out_dtype),
        grid_spec=pltpu.PrefetchScalarGridSpec(
            num_scalar_prefetch=0,
            grid=grid,
            in_specs=[
                # (tile_i, R*tile_j) adjacency block streamed over (i, j).
                # (On v7x, pipeline_mode=pl.Buffered(3) is worth a sweep if the
                # profile shows exposed DMA at the top of each j step.)
                pl.BlockSpec((tile_i, num_rel * tile_j), lambda i, j: (i, j)),
                # Precomputed x @ W_r, stacked per relation, for the j tile.
                pl.BlockSpec((num_rel * tile_j, d_pad), lambda i, j: (j, 0)),
                # Precomputed root transform (+bias) for the i tile; constant
                # across j so it stays resident (no re-DMA per j step).
                pl.BlockSpec((tile_i, d_pad), lambda i, j: (i, 0)),
            ],
            out_specs=pl.BlockSpec((tile_i, d_pad), lambda i, j: (i, 0)),
            scratch_shapes=[pltpu.VMEM((tile_i, d_pad), jnp.float32)],
        ),
        compiler_params=pltpu.CompilerParams(
            dimension_semantics=("parallel", "arbitrary"),
            vmem_limit_bytes=vmem_limit,
        ),
    )(adj_fold, xw_stack, root)


# ----------------------------------------------------------------------------
# Per-layer precompute (tiny, O(N*F*D)): xw_r = x @ W_r, root = x @ W_root + b.
# ----------------------------------------------------------------------------
def _precompute_layer_inputs(h, w_rel, w_root, bias):
    """h: (N_pad, F_pad) -> (xw_stack bf16 (R*N_pad, D_pad), root f32 (N_pad, D_pad))."""
    hq = h.astype(jnp.bfloat16)
    num_rel = w_rel.shape[0]
    n_pad = h.shape[0]
    d_pad = w_root.shape[1]
    xw = jnp.einsum("nf,rfd->nrd", hq, w_rel.astype(jnp.bfloat16),
                    preferred_element_type=jnp.float32)
    xw_stack = xw.reshape(n_pad * num_rel, d_pad).astype(jnp.bfloat16)
    root = jnp.dot(hq, w_root.astype(jnp.bfloat16),
                   preferred_element_type=jnp.float32) + bias
    return xw_stack, root.astype(jnp.float32)


# ----------------------------------------------------------------------------
# Wrapper: BN folding, padding, relation fold, two tiled pallas_calls.
# ----------------------------------------------------------------------------
@functools.partial(jax.jit, static_argnames=("tile_i", "tile_j", "vmem_limit"))
def _rgcn_node_forward_impl(x, adj, params, *, tile_i, tile_j, vmem_limit):
    n, f = x.shape
    num_rel = params["w1_rel"].shape[0]
    hidden = params["w1_root"].shape[1]
    num_classes = params["w2_root"].shape[1]

    assert tile_i % LANE == 0 and tile_j % LANE == 0, "tiles must be multiples of 128"
    n128 = _round_up(n, LANE)
    tile_j = min(tile_j, n128)
    tile_i = min(tile_i, tile_j)
    tile_j = (tile_j // tile_i) * tile_i            # keep tile_i | tile_j
    n_pad = _round_up(n, tile_j)

    f_pad = _round_up(f, LANE)
    h_pad = _round_up(hidden, LANE)
    c_pad = _round_up(num_classes, LANE)

    # ---- Fold eval-mode BatchNorm into the conv weights / bias (exact) ----
    s1 = params["bn1_gamma"] / jnp.sqrt(params["bn1_var"] + BN_EPS)
    w1_root = params["w1_root"] * s1
    w1_rel = params["w1_rel"] * s1
    b1 = (params["b1"] - params["bn1_mean"]) * s1 + params["bn1_beta"]

    s2 = params["bn2_gamma"] / jnp.sqrt(params["bn2_var"] + BN_EPS)
    w2_root = params["w2_root"] * s2
    w2_rel = params["w2_rel"] * s2
    b2 = (params["b2"] - params["bn2_mean"]) * s2 + params["bn2_beta"]

    # ---- Zero-pad to lane-dense (x128) shapes; padding is mathematically inert ----
    def pad2(a, rows, cols):
        return jnp.pad(a, ((0, rows - a.shape[0]), (0, cols - a.shape[1])))

    def pad3(a, rows, cols):
        return jnp.pad(a, ((0, 0), (0, rows - a.shape[1]), (0, cols - a.shape[2])))

    x_p = pad2(x, n_pad, f_pad)
    w1_root_p = pad2(w1_root, f_pad, h_pad)
    w1_rel_p = pad3(w1_rel, f_pad, h_pad)
    b1_p = pad2(b1, 1, h_pad)
    w2_root_p = pad2(w2_root, h_pad, c_pad)
    w2_rel_p = pad3(w2_rel, h_pad, c_pad)
    b2_p = pad2(b2, 1, c_pad)

    # Relation fold: column c = src*R + r, matching the row order of xw_stack.
    adj_p = jnp.pad(adj, ((0, 0), (0, n_pad - n), (0, n_pad - n)))
    adj_fold = jnp.transpose(adj_p, (1, 2, 0)).reshape(
        n_pad, n_pad * num_rel).astype(jnp.bfloat16)

    # ---- Layer 1 ----
    xw1, root1 = _precompute_layer_inputs(x_p, w1_rel_p, w1_root_p, b1_p)
    h1 = _rgcn_layer(adj_fold, xw1, root1, num_rel=num_rel,
                     tile_i=tile_i, tile_j=tile_j, final=False,
                     num_valid_out=hidden, out_dtype=jnp.float32,
                     vmem_limit=vmem_limit)

    # ---- Layer 2 (+ log_softmax) ----
    xw2, root2 = _precompute_layer_inputs(h1, w2_rel_p, w2_root_p, b2_p)
    out = _rgcn_layer(adj_fold, xw2, root2, num_rel=num_rel,
                      tile_i=tile_i, tile_j=tile_j, final=True,
                      num_valid_out=num_classes, out_dtype=jnp.float32,
                      vmem_limit=vmem_limit)
    return out[:n, :num_classes]


def rgcn_node_forward(x, adj, params, *, tile_i=None, tile_j=None, vmem_limit=None):
    """x: (N, F) f32, adj: (R, N, N) f32 normalized adjacency (1/|N_r(i)|)."""
    d_ti, d_tj, d_vm = _default_tiles()
    tile_i = d_ti if tile_i is None else tile_i
    tile_j = d_tj if tile_j is None else tile_j
    vmem_limit = d_vm if vmem_limit is None else vmem_limit
    return _rgcn_node_forward_impl(x, adj, params,
                                   tile_i=tile_i, tile_j=tile_j,
                                   vmem_limit=vmem_limit)


# ----------------------------------------------------------------------------
# Graph / parameter construction and a pure-JAX reference.
# ----------------------------------------------------------------------------
def build_normalized_adjacency(edge_index, edge_type, num_nodes, num_relations):
    """A[r, i, j] = 1/|N_r(i)| for each edge j -> i of relation r (PyG mean norm)."""
    src, dst = edge_index[0], edge_index[1]
    adj = jnp.zeros((num_relations, num_nodes, num_nodes), jnp.float32)
    adj = adj.at[edge_type, dst, src].add(1.0)
    deg = adj.sum(axis=2, keepdims=True)
    adj = adj / jnp.maximum(deg, 1.0)
    return adj


def init_params(key, num_node_features, num_classes, num_relations, hidden=16):
    ks = jax.random.split(key, 14)

    def dense(k, fan_in, fan_out, *lead):
        scale = 1.0 / jnp.sqrt(jnp.float32(fan_in))
        return scale * jax.random.normal(k, (*lead, fan_in, fan_out), jnp.float32)

    return {
        "w1_rel": dense(ks[0], num_node_features, hidden, num_relations),
        "w1_root": dense(ks[1], num_node_features, hidden),
        "b1": 0.01 * jax.random.normal(ks[2], (1, hidden), jnp.float32),
        "bn1_gamma": 1.0 + 0.1 * jax.random.normal(ks[3], (1, hidden), jnp.float32),
        "bn1_beta": 0.1 * jax.random.normal(ks[4], (1, hidden), jnp.float32),
        "bn1_mean": 0.1 * jax.random.normal(ks[5], (1, hidden), jnp.float32),
        "bn1_var": 1.0 + 0.2 * jax.random.uniform(ks[6], (1, hidden), jnp.float32),
        "w2_rel": dense(ks[7], hidden, num_classes, num_relations),
        "w2_root": dense(ks[8], hidden, num_classes),
        "b2": 0.01 * jax.random.normal(ks[9], (1, num_classes), jnp.float32),
        "bn2_gamma": 1.0 + 0.1 * jax.random.normal(ks[10], (1, num_classes), jnp.float32),
        "bn2_beta": 0.1 * jax.random.normal(ks[11], (1, num_classes), jnp.float32),
        "bn2_mean": 0.1 * jax.random.normal(ks[12], (1, num_classes), jnp.float32),
        "bn2_var": 1.0 + 0.2 * jax.random.uniform(ks[13], (1, num_classes), jnp.float32),
    }


def reference_forward(x, adj, p):
    """Pure-JAX reference (eval semantics), mirroring the kernel's bf16
    quantization points (weights, adjacency, x@W products, layer-1 output) so
    the comparison is tight."""
    hi = jax.lax.Precision.HIGHEST
    bf = lambda a: a.astype(jnp.bfloat16).astype(jnp.float32)

    s1 = p["bn1_gamma"] / jnp.sqrt(p["bn1_var"] + BN_EPS)
    w1_rel = bf(p["w1_rel"] * s1)
    w1_root = bf(p["w1_root"] * s1)
    b1 = (p["b1"] - p["bn1_mean"]) * s1 + p["bn1_beta"]

    s2 = p["bn2_gamma"] / jnp.sqrt(p["bn2_var"] + BN_EPS)
    w2_rel = bf(p["w2_rel"] * s2)
    w2_root = bf(p["w2_root"] * s2)
    b2 = (p["b2"] - p["bn2_mean"]) * s2 + p["bn2_beta"]

    adj_q = bf(adj)
    x_q = bf(x)

    xw1 = bf(jnp.einsum("nf,rfd->rnd", x_q, w1_rel, precision=hi))
    h = jnp.dot(x_q, w1_root, precision=hi) + b1
    h = h + jnp.einsum("rij,rjd->id", adj_q, xw1, precision=hi)
    h = jnp.maximum(h, 0.0)

    h_q = bf(h)
    xw2 = bf(jnp.einsum("nf,rfd->rnd", h_q, w2_rel, precision=hi))
    o = jnp.dot(h_q, w2_root, precision=hi) + b2
    o = o + jnp.einsum("rij,rjd->id", adj_q, xw2, precision=hi)
    o = jnp.maximum(o, 0.0)
    return jax.nn.log_softmax(o, axis=1)


if __name__ == "__main__":
    num_nodes = 200
    num_edges = 800
    num_node_features = 8
    num_classes = 4
    num_relations = 3

    key = jax.random.PRNGKey(0)
    k_x, k_src, k_dst, k_et, k_par = jax.random.split(key, 5)

    x = jax.random.normal(k_x, (num_nodes, num_node_features), jnp.float32)
    edge_index = jnp.stack([
        jax.random.randint(k_src, (num_edges,), 0, num_nodes),
        jax.random.randint(k_dst, (num_edges,), 0, num_nodes),
    ])
    edge_type = jax.random.randint(k_et, (num_edges,), 0, num_relations)

    adj = build_normalized_adjacency(edge_index, edge_type, num_nodes, num_relations)
    params = init_params(k_par, num_node_features, num_classes, num_relations)

    # tile=128 at this small size exercises a real (2, 2) grid per layer.
    out = rgcn_node_forward(x, adj, params, tile_i=128, tile_j=128)
    out = jax.block_until_ready(out)

    ref = reference_forward(x, adj, params)
    assert out.shape == (num_nodes, num_classes)
    assert bool(jnp.all(jnp.isfinite(out)))
    assert bool(jnp.allclose(out, ref, atol=1e-2, rtol=1e-2))

    print("KERNEL_OK")
</pallas_src>

<mosaic_0001>
module attributes {stable_mosaic.version = 11 : i64} {
  func.func @_rgcn_layer_kernel(%arg0: i32, %arg1: i32, %arg2: memref<128x384xbf16, #tpu.memory_space<vmem>>, %arg3: memref<384x128xbf16, #tpu.memory_space<vmem>>, %arg4: memref<128x128xf32, #tpu.memory_space<vmem>>, %arg5: memref<128x128xf32, #tpu.memory_space<vmem>>, %arg6: memref<128x128xf32, #tpu.memory_space<vmem>>) attributes {dimension_semantics = [#tpu.dimension_semantics<parallel>, #tpu.dimension_semantics<arbitrary>], iteration_bounds = array<i64: 2, 2>, scalar_prefetch = 0 : i64, scratch_operands = 1 : i64, tpu.core_type = #tpu.core_type<tc>, window_params = [{transform_indices = @transform_0, window_bounds = array<i64: 128, 384>}, {transform_indices = @transform_1, window_bounds = array<i64: 384, 128>}, {transform_indices = @transform_2, window_bounds = array<i64: 128, 128>}, {transform_indices = @transform_3, window_bounds = array<i64: 128, 128>}]} {
    %c0 = arith.constant 0 : index
    %c0_0 = arith.constant 0 : index
    %0 = vector.load %arg2[%c0, %c0_0] : memref<128x384xbf16, #tpu.memory_space<vmem>>, vector<128x384xbf16>
    %c0_1 = arith.constant 0 : index
    %c0_2 = arith.constant 0 : index
    %1 = vector.load %arg3[%c0_1, %c0_2] : memref<384x128xbf16, #tpu.memory_space<vmem>>, vector<384x128xbf16>
    %cst = arith.constant dense<0.000000e+00> : vector<128x128xf32>
    %2 = tpu.matmul %0, %1, %cst {dimension_numbers = #tpu.dot_dimension_numbers<[1], [0], [0], [1], [0, 0, 1, 1], [], []>} : vector<128x384xbf16>, vector<384x128xbf16>, vector<128x128xf32> -> vector<128x128xf32>
    %c0_i32 = arith.constant 0 : i32
    %3 = arith.cmpi eq, %arg1, %c0_i32 : i32
    %4 = arith.extui %3 : i1 to i32
    %c0_i32_3 = arith.constant 0 : i32
    %5 = arith.cmpi ne, %4, %c0_i32_3 : i32
    scf.if %5 {
      %c0_7 = arith.constant 0 : index
      %c0_8 = arith.constant 0 : index
      %12 = vector.load %arg4[%c0_7, %c0_8] : memref<128x128xf32, #tpu.memory_space<vmem>>, vector<128x128xf32>
      %13 = arith.addf %12, %2 : vector<128x128xf32>
      %c0_9 = arith.constant 0 : index
      %c0_10 = arith.constant 0 : index
      %14 = vector.load %arg6[%c0_9, %c0_10] : memref<128x128xf32, #tpu.memory_space<vmem>>, vector<128x128xf32>
      tpu.vector_store %arg6[%c0_9, %c0_10], %13 {strides = array<i32>} : memref<128x128xf32, #tpu.memory_space<vmem>>, vector<128x128xf32>,
    } else {
    }
    %c0_i32_4 = arith.constant 0 : i32
    %6 = arith.cmpi sgt, %arg1, %c0_i32_4 : i32
    %7 = arith.extui %6 : i1 to i32
    %c0_i32_5 = arith.constant 0 : i32
    %8 = arith.cmpi ne, %7, %c0_i32_5 : i32
    scf.if %8 {
      %c0_7 = arith.constant 0 : index
      %c0_8 = arith.constant 0 : index
      %12 = vector.load %arg6[%c0_7, %c0_8] : memref<128x128xf32, #tpu.memory_space<vmem>>, vector<128x128xf32>
      %13 = arith.addf %12, %2 : vector<128x128xf32>
      %c0_9 = arith.constant 0 : index
      %c0_10 = arith.constant 0 : index
      %14 = vector.load %arg6[%c0_9, %c0_10] : memref<128x128xf32, #tpu.memory_space<vmem>>, vector<128x128xf32>
      tpu.vector_store %arg6[%c0_9, %c0_10], %13 {strides = array<i32>} : memref<128x128xf32, #tpu.memory_space<vmem>>, vector<128x128xf32>,
    } else {
    }
    %c1_i32 = arith.constant 1 : i32
    %9 = arith.cmpi eq, %arg1, %c1_i32 : i32
    %10 = arith.extui %9 : i1 to i32
    %c0_i32_6 = arith.constant 0 : i32
    %11 = arith.cmpi ne, %10, %c0_i32_6 : i32
    scf.if %11 {
      %c0_7 = arith.constant 0 : index
      %c0_8 = arith.constant 0 : index
      %12 = vector.load %arg6[%c0_7, %c0_8] : memref<128x128xf32, #tpu.memory_space<vmem>>, vector<128x128xf32>
      %cst_9 = arith.constant 0.000000e+00 : f32
      %13 = vector.broadcast %cst_9 : f32 to vector<128x128xf32>
      %14 = arith.maximumf %12, %13 : vector<128x128xf32>
      %c0_10 = arith.constant 0 : index
      %c0_11 = arith.constant 0 : index
      %15 = vector.load %arg5[%c0_10, %c0_11] : memref<128x128xf32, #tpu.memory_space<vmem>>, vector<128x128xf32>
      tpu.vector_store %arg5[%c0_10, %c0_11], %14 {strides = array<i32>} : memref<128x128xf32, #tpu.memory_space<vmem>>, vector<128x128xf32>,
    } else {
    }
    return
  }
  func.func @transform_0(%arg0: i32, %arg1: i32) -> (i32, i32) {
    %c0_i32 = arith.constant 0 : i32
    return %arg0, %arg1 : i32, i32
  }
  func.func @transform_1(%arg0: i32, %arg1: i32) -> (i32, i32) {
    %c0_i32 = arith.constant 0 : i32
    %c0_i32_0 = arith.constant 0 : i32
    return %arg1, %c0_i32 : i32, i32
  }
  func.func @transform_2(%arg0: i32, %arg1: i32) -> (i32, i32) {
    %c0_i32 = arith.constant 0 : i32
    %c0_i32_0 = arith.constant 0 : i32
    return %arg0, %c0_i32 : i32, i32
  }
  func.func @transform_3(%arg0: i32, %arg1: i32) -> (i32, i32) {
    %c0_i32 = arith.constant 0 : i32
    %c0_i32_0 = arith.constant 0 : i32
    return %arg0, %c0_i32 : i32, i32
  }
}

module attributes {stable_mosaic.version = 11 : i64} {
  func.func @_rgcn_layer_kernel(%arg0: i32, %arg1: i32, %arg2: memref<128x384xbf16, #tpu.memory_space<vmem>>, %arg3: memref<384x128xbf16, #tpu.memory_space<vmem>>, %arg4: memref<128x128xf32, #tpu.memory_space<vmem>>, %arg5: memref<128x128xf32, #tpu.memory_space<vmem>>, %arg6: memref<128x128xf32, #tpu.memory_space<vmem>>) attributes {dimension_semantics = [#tpu.dimension_semantics<parallel>, #tpu.dimension_semantics<arbitrary>], iteration_bounds = array<i64: 2, 2>, scalar_prefetch = 0 : i64, scratch_operands = 1 : i64, tpu.core_type = #tpu.core_type<tc>, window_params = [{transform_indices = @transform_0, window_bounds = array<i64: 128, 384>}, {transform_indices = @transform_1, window_bounds = array<i64: 384, 128>}, {transform_indices = @transform_2, window_bounds = array<i64: 128, 128>}, {transform_indices = @transform_3, window_bounds = array<i64: 128, 128>}]} {
    %c0 = arith.constant 0 : index
    %c0_0 = arith.constant 0 : index
    %0 = vector.load %arg2[%c0, %c0_0] : memref<128x384xbf16, #tpu.memory_space<vmem>>, vector<128x384xbf16>
    %c0_1 = arith.constant 0 : index
    %c0_2 = arith.constant 0 : index
    %1 = vector.load %arg3[%c0_1, %c0_2] : memref<384x128xbf16, #tpu.memory_space<vmem>>, vector<384x128xbf16>
    %cst = arith.constant dense<0.000000e+00> : vector<128x128xf32>
    %2 = tpu.matmul %0, %1, %cst {dimension_numbers = #tpu.dot_dimension_numbers<[1], [0], [0], [1], [0, 0, 1, 1], [], []>} : vector<128x384xbf16>, vector<384x128xbf16>, vector<128x128xf32> -> vector<128x128xf32>
    %c0_i32 = arith.constant 0 : i32
    %3 = arith.cmpi eq, %arg1, %c0_i32 : i32
    %4 = arith.extui %3 : i1 to i32
    %c0_i32_3 = arith.constant 0 : i32
    %5 = arith.cmpi ne, %4, %c0_i32_3 : i32
    scf.if %5 {
      %c0_7 = arith.constant 0 : index
      %c0_8 = arith.constant 0 : index
      %12 = vector.load %arg4[%c0_7, %c0_8] : memref<128x128xf32, #tpu.memory_space<vmem>>, vector<128x128xf32>
      %13 = arith.addf %12, %2 : vector<128x128xf32>
      %c0_9 = arith.constant 0 : index
      %c0_10 = arith.constant 0 : index
      %14 = vector.load %arg6[%c0_9, %c0_10] : memref<128x128xf32, #tpu.memory_space<vmem>>, vector<128x128xf32>
      tpu.vector_store %arg6[%c0_9, %c0_10], %13 {strides = array<i32>} : memref<128x128xf32, #tpu.memory_space<vmem>>, vector<128x128xf32>,
    } else {
    }
    %c0_i32_4 = arith.constant 0 : i32
    %6 = arith.cmpi sgt, %arg1, %c0_i32_4 : i32
    %7 = arith.extui %6 : i1 to i32
    %c0_i32_5 = arith.constant 0 : i32
    %8 = arith.cmpi ne, %7, %c0_i32_5 : i32
    scf.if %8 {
      %c0_7 = arith.constant 0 : index
      %c0_8 = arith.constant 0 : index
      %12 = vector.load %arg6[%c0_7, %c0_8] : memref<128x128xf32, #tpu.memory_space<vmem>>, vector<128x128xf32>
      %13 = arith.addf %12, %2 : vector<128x128xf32>
      %c0_9 = arith.constant 0 : index
      %c0_10 = arith.constant 0 : index
      %14 = vector.load %arg6[%c0_9, %c0_10] : memref<128x128xf32, #tpu.memory_space<vmem>>, vector<128x128xf32>
      tpu.vector_store %arg6[%c0_9, %c0_10], %13 {strides = array<i32>} : memref<128x128xf32, #tpu.memory_space<vmem>>, vector<128x128xf32>,
    } else {
    }
    %c1_i32 = arith.constant 1 : i32
    %9 = arith.cmpi eq, %arg1, %c1_i32 : i32
    %10 = arith.extui %9 : i1 to i32
    %c0_i32_6 = arith.constant 0 : i32
    %11 = arith.cmpi ne, %10, %c0_i32_6 : i32
    scf.if %11 {
      %c0_7 = arith.constant 0 : index
      %c0_8 = arith.constant 0 : index
      %12 = vector.load %arg6[%c0_7, %c0_8] : memref<128x128xf32, #tpu.memory_space<vmem>>, vector<128x128xf32>
      %cst_9 = arith.constant 0.000000e+00 : f32
      %13 = vector.broadcast %cst_9 : f32 to vector<128x128xf32>
      %14 = arith.maximumf %12, %13 : vector<128x128xf32>
      %15 = tpu.iota {dimensions = array<i32: 1>} : vector<128x128xi32>
      %c4_i32 = arith.constant 4 : i32
      %16 = vector.broadcast %c4_i32 : i32 to vector<128x128xi32>
      %17 = arith.cmpi slt, %15, %16 : vector<128x128xi32>
      %cst_10 = arith.constant -1.000000e+30 : f32
      %18 = vector.broadcast %cst_10 : f32 to vector<128x128xf32>
      %19 = arith.select %17, %14, %18 : vector<128x128xi1>, vector<128x128xf32>
      %cst_11 = arith.constant dense<0xFF800000> : vector<128xf32>
      %20 = vector.multi_reduction <maximumf>, %19, %cst_11 [1] : vector<128x128xf32> to vector<128xf32>
      %21 = vector.shape_cast %20 : vector<128xf32> to vector<128x1xf32>
      %22 = vector.broadcast %21 : vector<128x1xf32> to vector<128x128xf32>
      %23 = arith.subf %19, %22 : vector<128x128xf32>
      %24 = math.exp %23 : vector<128x128xf32>
      %cst_12 = arith.constant dense<0.000000e+00> : vector<128xf32>
      %25 = vector.multi_reduction <add>, %24, %cst_12 [1] : vector<128x128xf32> to vector<128xf32>
      %26 = vector.shape_cast %25 : vector<128xf32> to vector<128x1xf32>
      %27 = math.log %26 : vector<128x1xf32>
      %28 = vector.broadcast %27 : vector<128x1xf32> to vector<128x128xf32>
      %29 = arith.subf %23, %28 : vector<128x128xf32>
      %c0_13 = arith.constant 0 : index
      %c0_14 = arith.constant 0 : index
      %30 = vector.load %arg5[%c0_13, %c0_14] : memref<128x128xf32, #tpu.memory_space<vmem>>, vector<128x128xf32>
      tpu.vector_store %arg5[%c0_13, %c0_14], %29 {strides = array<i32>} : memref<128x128xf32, #tpu.memory_space<vmem>>, vector<128x128xf32>,
    } else {
    }
    return
  }
  func.func @transform_0(%arg0: i32, %arg1: i32) -> (i32, i32) {
    %c0_i32 = arith.constant 0 : i32
    return %arg0, %arg1 : i32, i32
  }
  func.func @transform_1(%arg0: i32, %arg1: i32) -> (i32, i32) {
    %c0_i32 = arith.constant 0 : i32
    %c0_i32_0 = arith.constant 0 : i32
    return %arg1, %c0_i32 : i32, i32
  }
  func.func @transform_2(%arg0: i32, %arg1: i32) -> (i32, i32) {
    %c0_i32 = arith.constant 0 : i32
    %c0_i32_0 = arith.constant 0 : i32
    return %arg0, %c0_i32 : i32, i32
  }
  func.func @transform_3(%arg0: i32, %arg1: i32) -> (i32, i32) {
    %c0_i32 = arith.constant 0 : i32
    %c0_i32_0 = arith.constant 0 : i32
    return %arg0, %c0_i32 : i32, i32
  }
}

</mosaic_0001>

<bundles_post_ra>
// kernel: _rgcn_node_forward_impl.2
= control target key start
LH: loop header
LB: loop body
LE: loop exit
PB: predicated region body
PF: predicated region fallthrough
CT: control target
= control target key end

     0   :  { %s1535_s12 = smov 0   ;;  %s1537_s13 = smov 0   ;;  %s1853_s0 = inlined_call_operand.vmem [shape: bf16[256,768], index: 0, kind: input, shape index: {}]   ;;  %s1854_s1 = inlined_call_operand.vmem [shape: bf16[768,128], index: 1, kind: input, shape index: {}]   ;;  %s1855_s2 = inlined_call_operand.vmem [shape: f32[256,128], index: 2, kind: input, shape index: {}]   ;;  %s1856_s3 = inlined_call_operand.vmem [shape: f32[256,128], index: 3, kind: output, shape index: {}]  }
   0x1   :  { %s1539_s14 = smov 0   ;;  %s1541_s15 = smov 0  }
   0x2   :  { %s1543_s16 = smov 0   ;;  %s1545_s17 = smov 0  }
   0x3   :  { %s1547_s18 = smov 0  }
   0x4 LB: > { %s22_s19 = sadd.s32 1, %s1505_s16  ;;  %s25_s20 = sadd.s32 1, %s1509_s17  ;;  %s1513_s18 = sphi %s1547_s18, %s13_s18   ;;  %s1509_s17 = sphi %s1545_s17, %s1862_s17   ;;  %s1505_s16 = sphi %s1543_s16, %s1861_s16   ;;  %s1501_s15 = sphi %s1541_s15, %s1860_s15   ;;  %s1497_s14 = sphi %s1539_s14, %s1859_s14   ;;  %s1493_s13 = sphi %s1537_s13, %s1858_s13   ;;  %s1489_s12 = sphi %s1535_s12, %s1857_s12  }
   0x5   : > { %p23_p0 = scmp.ge.s32.totalorder %s22_s19, 2  ;;  %p41_p1 = scmp.ne.s32.totalorder %s1493_s13, %s1489_s12 }
   0x6   : > { %p42_p2 = scmp.eq.s32.totalorder %s1513_s18, 0  ;;  %s34_s24 = sadd.s32 1, %s1493_s13 }
   0x7   : > { %s1864_s19 = smov (%p23_p0, %s22_s19), 0  ;;  %s1866_s20 = smov (!%p23_p0, %s25_s20), %s1509_s17 }
   0x8   : > { %p43_p3 = por %p42_p2, %p41_p1  ;;  %p27_p4 = scmp.ge.s32.totalorder %s1866_s20, 2 }
   0x9   : > { %s30_s21 = ssub.s32 %s1505_s16, %s1864_s19  ;;  %p1137_p6 = scmp.ge.s32.totalorder %s1513_s18, 4 }
   0xa   : > { %s1868_s20 = smov (%p27_p4, %s1866_s20), 0 }
   0xb   : > { %s29_s22 = ssub.s32 %s1509_s17, %s1868_s20  ;;  %145 = sbr.rel (%p1137_p6) target bundleno = 45 (0x2d), region = 16 }
   0xc   : > { %s31_s23 = sor.u32 %s30_s21, %s29_s22 }
   0xd   : > { %p32_p5 = scmp.eq.s32.totalorder %s31_s23, 0 }
   0xf   : > { %s1586_s25 = scalar_select %p32_p5, %s1493_s13, %s34_s24  }
  0x12   : > { %148 = sbr.rel (!%p43_p3) target bundleno = 45 (0x2d), region = 20  ;;  %s150_s26 = sand.u32 (%p43_p3), 1, %s1493_s13  }
  0x13   : > { %s154_s27 = smul.u32 (%p43_p3), 3, %s1505_s16 }
  0x14   : > { %s1344_s28 = smul.u32 (%p43_p3), 192, %s150_s26 }
  0x15   : > { %s1345_s29 = smul.u32 (%p43_p3), 96, %s1509_s17 }
  0x16   : > { %s1600_s8 = scalar_lea.vmem (%p43_p3), [#allocation3], %s1344_s28 }
  0x17   : > { %s156_s30 = sadd.s32 (%p43_p3), %s1345_s29, %s154_s27 }
  0x18   : > { %s1140_s4 = sshll.u32 (%p43_p3), %s156_s30, 2 }
  0x19   : > { %s1595_s7 = scalar_lea.vmem %s1853_s0, %s1140_s4 }
  0x1a   : > { %v173_v0 = vld [vmem:[%s1595_s7] sm:$0xff]  ;;  %v175_v1 = vld [vmem:[%s1595_s7 + $0x18] sm:$0xff]  ;;  %v177_v2 = vld [vmem:[%s1595_s7 + $0x30] sm:$0xff] }
  0x1b   : > { %174 = vst [vmem:[%s1600_s8] sm:$0xff] %v173_v0  ;;  %176 = vst [vmem:[%s1600_s8 + $0xc] sm:$0xff] %v175_v1  ;;  %v179_v3 = vld [vmem:[%s1595_s7 + $0x48] sm:$0xff]  ;;  %v181_v4 = vld [vmem:[%s1595_s7 + $0x60] sm:$0xff] }
  0x1c   : > { %178 = vst [vmem:[%s1600_s8 + $0x18] sm:$0xff] %v177_v2  ;;  %v183_v5 = vld [vmem:[%s1595_s7 + $0x78] sm:$0xff]  ;;  %180 = vst [vmem:[%s1600_s8 + $0x24] sm:$0xff] %v179_v3  ;;  %v185_v6 = vld [vmem:[%s1595_s7 + $0x90] sm:$0xff] }
  0x1d   : > { %182 = vst [vmem:[%s1600_s8 + $0x30] sm:$0xff] %v181_v4  ;;  %184 = vst [vmem:[%s1600_s8 + $0x3c] sm:$0xff] %v183_v5  ;;  %v187_v7 = vld [vmem:[%s1595_s7 + $0xa8] sm:$0xff]  ;;  %v189_v8 = vld [vmem:[%s1595_s7 + $0xc0] sm:$0xff] }
  0x1e   : > { %186 = vst [vmem:[%s1600_s8 + $0x48] sm:$0xff] %v185_v6  ;;  %188 = vst [vmem:[%s1600_s8 + $0x54] sm:$0xff] %v187_v7  ;;  %v191_v9 = vld [vmem:[%s1595_s7 + $0xd8] sm:$0xff]  ;;  %v193_v10 = vld [vmem:[%s1595_s7 + $0xf0] sm:$0xff] }
  0x1f   : > { %190 = vst [vmem:[%s1600_s8 + $0x60] sm:$0xff] %v189_v8  ;;  %v195_v11 = vld [vmem:[%s1595_s7 + $0x108] sm:$0xff]  ;;  %192 = vst [vmem:[%s1600_s8 + $0x6c] sm:$0xff] %v191_v9  ;;  %v197_v12 = vld [vmem:[%s1595_s7 + $0x120] sm:$0xff] }
  0x20   : > { %194 = vst [vmem:[%s1600_s8 + $0x78] sm:$0xff] %v193_v10  ;;  %196 = vst [vmem:[%s1600_s8 + $0x84] sm:$0xff] %v195_v11  ;;  %v199_v13 = vld [vmem:[%s1595_s7 + $0x138] sm:$0xff]  ;;  %v201_v14 = vld [vmem:[%s1595_s7 + $0x150] sm:$0xff] }
  0x21   : > { %198 = vst [vmem:[%s1600_s8 + $0x90] sm:$0xff] %v197_v12  ;;  %200 = vst [vmem:[%s1600_s8 + $0x9c] sm:$0xff] %v199_v13  ;;  %v203_v15 = vld [vmem:[%s1595_s7 + $0x168] sm:$0xff]  ;;  %v1143_v17 = vld [vmem:[%s1595_s7 + $0x20] sm:$0xf] }
  0x22   : > { %202 = vst [vmem:[%s1600_s8 + $0xa8] sm:$0xff] %v201_v14  ;;  %v1141_v16 = vld [vmem:[%s1595_s7 + $0x8] sm:$0xf]  ;;  %204 = vst [vmem:[%s1600_s8 + $0xb4] sm:$0xff] %v203_v15  ;;  %v1145_v18 = vld [vmem:[%s1595_s7 + $0x38] sm:$0xf] }
  0x23   : > { %1142 = vst [vmem:[%s1600_s8 + $0x8] sm:$0xf] %v1141_v16  ;;  %1144 = vst [vmem:[%s1600_s8 + $0x14] sm:$0xf] %v1143_v17  ;;  %v1147_v19 = vld [vmem:[%s1595_s7 + $0x50] sm:$0xf] }
  0x24   : > { %v1149_v20 = vld [vmem:[%s1595_s7 + $0x68] sm:$0xf]  ;;  %1146 = vst [vmem:[%s1600_s8 + $0x20] sm:$0xf] %v1145_v18  ;;  %1148 = vst [vmem:[%s1600_s8 + $0x2c] sm:$0xf] %v1147_v19 }
  0x25   : > { %1150 = vst [vmem:[%s1600_s8 + $0x38] sm:$0xf] %v1149_v20  ;;  %v1151_v21 = vld [vmem:[%s1595_s7 + $0x80] sm:$0xf]  ;;  %v1153_v22 = vld [vmem:[%s1595_s7 + $0x98] sm:$0xf] }
  0x26   : > { %v1155_v23 = vld [vmem:[%s1595_s7 + $0xb0] sm:$0xf]  ;;  %1152 = vst [vmem:[%s1600_s8 + $0x44] sm:$0xf] %v1151_v21  ;;  %1154 = vst [vmem:[%s1600_s8 + $0x50] sm:$0xf] %v1153_v22 }
  0x27   : > { %1156 = vst [vmem:[%s1600_s8 + $0x5c] sm:$0xf] %v1155_v23  ;;  %v1157_v24 = vld [vmem:[%s1595_s7 + $0xc8] sm:$0xf]  ;;  %v1159_v25 = vld [vmem:[%s1595_s7 + $0xe0] sm:$0xf] }
  0x28   : > { %v1161_v26 = vld [vmem:[%s1595_s7 + $0xf8] sm:$0xf]  ;;  %1158 = vst [vmem:[%s1600_s8 + $0x68] sm:$0xf] %v1157_v24  ;;  %1160 = vst [vmem:[%s1600_s8 + $0x74] sm:$0xf] %v1159_v25 }
  0x29   : > { %1162 = vst [vmem:[%s1600_s8 + $0x80] sm:$0xf] %v1161_v26  ;;  %v1163_v27 = vld [vmem:[%s1595_s7 + $0x110] sm:$0xf]  ;;  %v1165_v28 = vld [vmem:[%s1595_s7 + $0x128] sm:$0xf] }
  0x2a   : > { %v1167_v29 = vld [vmem:[%s1595_s7 + $0x140] sm:$0xf]  ;;  %1164 = vst [vmem:[%s1600_s8 + $0x8c] sm:$0xf] %v1163_v27  ;;  %1166 = vst [vmem:[%s1600_s8 + $0x98] sm:$0xf] %v1165_v28 }
  0x2b   : > { %1168 = vst [vmem:[%s1600_s8 + $0xa4] sm:$0xf] %v1167_v29  ;;  %v1169_v30 = vld [vmem:[%s1595_s7 + $0x158] sm:$0xf]  ;;  %v1171_v31 = vld [vmem:[%s1595_s7 + $0x170] sm:$0xf] }
  0x2c   : > { %1170 = vst [vmem:[%s1600_s8 + $0xb0] sm:$0xf] %v1169_v30  ;;  %1172 = vst [vmem:[%s1600_s8 + $0xbc] sm:$0xf] %v1171_v31 }
  0x2d PF: > { %p1173_p7 = scmp.ge.s32.totalorder %s1513_s18, 1  ;;  %p266_p8 = scmp.lt.s32.totalorder %s1513_s18, 5 }
  0x2f   : > { %p267_p9 = pnand %p1173_p7, %p266_p8 }
  0x30   : > { %s308_s9 = smul.u32 (!%p267_p9), 48, %s1497_s14  ;;  %s1175_s10 = sshll.u32 (!%p267_p9), %s1501_s15, 4 }
  0x31   : > { %270 = sbr.rel (%p267_p9) target bundleno = 396 (0x18c), region = 54  ;;  %p315_p10 = scmp.lt.s32.totalorder (!%p267_p9), %s1175_s10, 31 }
  0x32   : > { %s273_s11 = sand.u32 (!%p267_p9), 1, %s1489_s12   ;;  %p309_p11 = scmp.lt.s32.totalorder (!%p267_p9), %s308_s9, 95 }
  0x33   : > { %s1346_s21 = smul.u32 (!%p267_p9), 192, %s273_s11  ;;  %p1227_p12 = scmp.ne.s32.totalorder (!%p267_p9), %s1497_s14, 0 }
  0x35   : > { %s1673_s28 = scalar_lea.vmem (!%p267_p9), [#allocation3], %s1346_s21 }
  0x36   : > { %v1429_v32 = vld [vmem:[%s1673_s28 + $0x4] ss:$12 sps:$4 sm:$0xff] (!%p267_p9)   ;;  %v1430_v55 = vld [vmem:[%s1673_s28 + $0x8] ss:$12 sps:$4 sm:$0xff] (!%p267_p9)   ;;  %v1427_v58 = vld [vmem:[%s1673_s28] ss:$12 sps:$4 sm:$0xff] (!%p267_p9)  }
  0x37   : > { %711 = vmatprep.mubr.bf16.mxu0 (!%p267_p9), %v1429_v32  ;;  %1328 = vmatprep.mubr.bf16.mxu1 (!%p267_p9), %v1430_v55  ;;  %v1432_v59 = vld [vmem:[%s1673_s28 + $0x1c] ss:$12 sps:$4 sm:$0xff] (!%p267_p9)   ;;  %v1431_v60 = vld [vmem:[%s1673_s28 + $0x20] ss:$12 sps:$4 sm:$0xff] (!%p267_p9)   ;;  %v1438_v61 = vld [vmem:[%s1673_s28 + $0x38] ss:$12 sps:$4 sm:$0xff] (!%p267_p9)  }
  0x38   : > { %s1870_s10 = smov (!%p315_p10, %s1175_s10), 31  ;;  %s1872_s9 = smov (!%p309_p11, %s308_s9), 95  ;;  %v1434_v62 = vld [vmem:[%s1673_s28 + $0x18] ss:$12 sps:$4 sm:$0xff]   ;;  %v1435_v63 = vld [vmem:[%s1673_s28 + $0x34] ss:$12 sps:$4 sm:$0xff]  }
  0x39   : > { %s1176_s22 = sshll.u32 %s1870_s10, 3  ;;  %s1174_s23 = sshll.u32 %s1872_s9, 2  ;;  %v1439_v0 = vld [vmem:[%s1673_s28 + $0x50] ss:$12 sps:$4 sm:$0xff]   ;;  %v1446_v1 = vld [vmem:[%s1673_s28 + $0x68] ss:$12 sps:$4 sm:$0xff]  }
  0x3a   : > { %s1671_s27 = scalar_lea.vmem %s1855_s2, %s1176_s22  ;;  %s1678_s15 = scalar_lea.vmem %s1854_s1, %s1174_s23  ;;  %v1437_v2 = vld [vmem:[%s1673_s28 + $0x30] ss:$12 sps:$4 sm:$0xff]   ;;  %v1440_v3 = vld [vmem:[%s1673_s28 + $0x4c] ss:$12 sps:$4 sm:$0xff]   ;;  %v1442_v6 = vld [vmem:[%s1673_s28 + $0x48] ss:$12 sps:$4 sm:$0xff]  }
  0x3b   : > { %s1683_s5 = scalar_lea.vmem %s1856_s3, %s1176_s22  ;;  %v1403_v33 = vld [vmem:[%s1678_s15 + $0x40] sm:$0xff]   ;;  %v1406_v36 = vld [vmem:[%s1678_s15 + $0x48] sm:$0xff]   ;;  %v1409_v39 = vld [vmem:[%s1678_s15 + $0x50] sm:$0xff]  }
  0x3c   : > { %v1404_v34 = vld [vmem:[%s1678_s15] sm:$0xff]   ;;  %1232 = vmatprep.subr.bf16.mxu0 %v1403_v33  ;;  %v1407_v37 = vld [vmem:[%s1678_s15 + $0x8] sm:$0xff]   ;;  %v1410_v40 = vld [vmem:[%s1678_s15 + $0x10] sm:$0xff]  }
  0x3d   : > { %v1405_v35 = vld [vmem:[%s1678_s15 + $0x80] sm:$0xff]   ;;  %1233 = vmatpush3.bf16.msra.mxu0 %v1404_v34  ;;  %v1408_v38 = vld [vmem:[%s1678_s15 + $0x88] sm:$0xff]   ;;  %v1411_v41 = vld [vmem:[%s1678_s15 + $0x90] sm:$0xff]  }
  0x3e   : > { %1312 = vmatprep.subr.bf16.mxu1 %v1405_v35  ;;  %1234 = vmatprep.subr.bf16.mxu0 %v1406_v36  ;;  %v1412_v42 = vld [vmem:[%s1678_s15 + $0x58] sm:$0xff]   ;;  %v1415_v45 = vld [vmem:[%s1678_s15 + $0x60] sm:$0xff]   ;;  %v1418_v48 = vld [vmem:[%s1678_s15 + $0x68] sm:$0xff]  }
  0x3f   : > { %1313 = vmatpush3.bf16.msra.mxu1 %v1405_v35  ;;  %v1413_v43 = vld [vmem:[%s1678_s15 + $0x18] sm:$0xff]   ;;  %v1417_v46 = vld [vmem:[%s1678_s15 + $0xa0] sm:$0xff]   ;;  %v1420_v49 = vld [vmem:[%s1678_s15 + $0xa8] sm:$0xff]  }
  0x40   : > { %1314 = vmatprep.subr.bf16.mxu1 %v1408_v38  ;;  %v1414_v44 = vld [vmem:[%s1678_s15 + $0x98] sm:$0xff]   ;;  %v1416_v47 = vld [vmem:[%s1678_s15 + $0x20] sm:$0xff]   ;;  %v1419_v50 = vld [vmem:[%s1678_s15 + $0x28] sm:$0xff]  }
  0x41   : > { %1235 = vmatpush3.bf16.msra.mxu0 %v1407_v37  ;;  %v1421_v51 = vld [vmem:[%s1678_s15 + $0x70] sm:$0xff]   ;;  %v1424_v54 = vld [vmem:[%s1678_s15 + $0x78] sm:$0xff]   ;;  %v1447_v4 = vld [vmem:[%s1673_s28 + $0x80] ss:$12 sps:$4 sm:$0xff]  }
  0x42   : > { %1236 = vmatprep.subr.bf16.mxu0 %v1409_v39  ;;  %v1422_v52 = vld [vmem:[%s1678_s15 + $0x30] sm:$0xff]   ;;  %v1426_v56 = vld [vmem:[%s1678_s15 + $0xb8] sm:$0xff]   ;;  %v1445_v9 = vld [vmem:[%s1673_s28 + $0x60] ss:$12 sps:$4 sm:$0xff]  }
  0x43   : > { %1315 = vmatpush3.bf16.msra.mxu1 %v1408_v38  ;;  %v1423_v53 = vld [vmem:[%s1678_s15 + $0xb0] sm:$0xff]   ;;  %v1425_v57 = vld [vmem:[%s1678_s15 + $0x38] sm:$0xff]  }
  0x44   : > { %1316 = vmatprep.subr.bf16.mxu1 %v1411_v41  ;;  %v1454_v5 = vld [vmem:[%s1673_s28 + $0x98] ss:$12 sps:$4 sm:$0xff]   ;;  %v1455_v8 = vld [vmem:[%s1673_s28 + $0xb0] ss:$12 sps:$4 sm:$0xff]   ;;  %v1451_v12 = vld [vmem:[%s1673_s28 + $0x94] ss:$12 sps:$4 sm:$0xff]  }
  0x45   : > { %1237 = vmatpush3.bf16.msra.mxu0 %v1410_v40  ;;  %v1443_v7 = vld [vmem:[%s1673_s28 + $0x64] ss:$12 sps:$4 sm:$0xff]   ;;  %v1448_v10 = vld [vmem:[%s1673_s28 + $0x7c] ss:$12 sps:$4 sm:$0xff]   ;;  %v1456_v14 = vld [vmem:[%s1673_s28 + $0xac] ss:$12 sps:$4 sm:$0xff]  }
  0x46   : > { %1238 = vmatprep.subr.bf16.mxu0 %v1412_v42  ;;  %v1450_v11 = vld [vmem:[%s1673_s28 + $0x78] ss:$12 sps:$4 sm:$0xff]   ;;  %v1453_v13 = vld [vmem:[%s1673_s28 + $0x90] ss:$12 sps:$4 sm:$0xff]   ;;  %v1458_v15 = vld [vmem:[%s1673_s28 + $0xa8] ss:$12 sps:$4 sm:$0xff]  }
  0x47   : > { %1317 = vmatpush3.bf16.msra.mxu1 %v1411_v41 }
  0x48   : > { %1318 = vmatprep.subr.bf16.mxu1 %v1414_v44 }
  0x49   : > { %1239 = vmatpush3.bf16.msra.mxu0 %v1413_v43 }
  0x4a   : > { %1240 = vmatprep.subr.bf16.mxu0 %v1415_v45 }
  0x4b   : > { %1319 = vmatpush3.bf16.msra.mxu1 %v1414_v44 }
  0x4c   : > { %1320 = vmatprep.subr.bf16.mxu1 %v1417_v46 }
  0x4d   : > { %1241 = vmatpush3.bf16.msra.mxu0 %v1416_v47 }
  0x4e   : > { %1242 = vmatprep.subr.bf16.mxu0 %v1418_v48 }
  0x4f   : > { %1321 = vmatpush3.bf16.msra.mxu1 %v1417_v46 }
  0x50   : > { %1322 = vmatprep.subr.bf16.mxu1 %v1420_v49 }
  0x51   : > { %1243 = vmatpush3.bf16.msra.mxu0 %v1419_v50 }
  0x52   : > { %1244 = vmatprep.subr.bf16.mxu0 %v1421_v51 }
  0x53   : > { %1323 = vmatpush3.bf16.msra.mxu1 %v1420_v49 }
  0x54   : > { %1324 = vmatprep.subr.bf16.mxu1 %v1423_v53 }
  0x55   : > { %1245 = vmatpush3.bf16.msra.mxu0 %v1422_v52 }
  0x56   : > { %1246 = vmatprep.subr.bf16.mxu0 %v1424_v54 }
  0x57   : > { %1325 = vmatpush3.bf16.msra.mxu1 %v1423_v53 }
  0x58   : > { %1326 = vmatprep.subr.bf16.mxu1 %v1426_v56 }
  0x59   : > { %1247 = vmatpush3.bf16.msra.mxu0 %v1425_v57 }
  0x5b   : > { %1327 = vmatpush3.bf16.msra.mxu1 %v1426_v56 }
  0x5c   : > { %712 = vmatmul.mubr.bf16.vlgmr.msra.gmra.mrb[0].mxu0 %v1427_v58 }
  0x5d   : > { %719 = vmatprep.mubr.bf16.mxu0 %v1432_v59 }
  0x5e   : > { %1329 = vmatmul.mubr.bf16.vlgmr.msra.gmra.mrb[0].mxu1 %v1431_v60 }
  0x5f   : > { %1332 = vmatprep.mubr.bf16.mxu1 %v1438_v61 }
  0x64   : > { %720 = vmatmul.mubr.bf16.gmra.mrb[4].mxu0 %v1434_v62 }
  0x65   : > { %727 = vmatprep.mubr.bf16.mxu0 %v1435_v63 }
  0x66   : > { %1333 = vmatmul.mubr.bf16.gmra.mrb[4].mxu1 %v1439_v0 }
  0x67   : > { %1336 = vmatprep.mubr.bf16.mxu1 %v1446_v1 }
  0x6c   : > { %728 = vmatmul.mubr.bf16.gmra.mrb[8].mxu0 %v1437_v2 }
  0x6d   : > { %735 = vmatprep.mubr.bf16.mxu0 %v1440_v3 }
  0x6e   : > { %1337 = vmatmul.mubr.bf16.gmra.mrb[8].mxu1 %v1447_v4 }
  0x6f   : > { %1340 = vmatprep.mubr.bf16.mxu1 %v1454_v5 }
  0x74   : > { %736 = vmatmul.mubr.bf16.gmra.mrb[12].mxu0 %v1442_v6 }
  0x75   : > { %743 = vmatprep.mubr.bf16.mxu0 %v1443_v7 }
  0x76   : > { %1341 = vmatmul.mubr.bf16.gmra.mrb[12].mxu1 %v1455_v8 }
  0x7c   : > { %744 = vmatmul.mubr.bf16.gmra.mrb[16].mxu0 %v1445_v9 }
  0x7d   : > { %751 = vmatprep.mubr.bf16.mxu0 %v1448_v10 }
  0x84   : > { %752 = vmatmul.mubr.bf16.gmra.mrb[20].mxu0 %v1450_v11 }
  0x85   : > { %759 = vmatprep.mubr.bf16.mxu0 %v1451_v12 }
  0x8c   : > { %760 = vmatmul.mubr.bf16.gmra.mrb[24].mxu0 %v1453_v13 }
  0x8d   : > { %767 = vmatprep.mubr.bf16.mxu0 %v1456_v14 }
  0x94   : > { %768 = vmatmul.mubr.bf16.gmra.mrb[28].mxu0 %v1458_v15 }
 0x12f   : > { %v1248_v16 = vpop.f32.mrb[0].mxu0 }
 0x130   : > { %v1249_v17 = vpop.f32.mrb[1].mxu0 }
 0x131   : > { %v1250_v18 = vadd.f32 %v1249_v17, %v1248_v16  ;;  %v1251_v19 = vpop.f32.mrb[2].mxu0  ;;  %v1330_v20 = vpop.f32.mrb[0].mxu1 }
 0x132   : > { %v1252_v21 = vpop.f32.mrb[3].mxu0  ;;  %v810_v22 = vpop.f32.mrb[1].mxu1 }
 0x133   : > { %v1253_v23 = vadd.f32 %v1252_v21, %v1251_v19  ;;  %v1733_v24 = vadd.f32 %v1250_v18, %v810_v22  ;;  %v1331_v25 = vpop.f32.mrb[2].mxu1 }
 0x134   : > { %v813_v26 = vpop.f32.mrb[3].mxu1 }
 0x135   : > { %v1735_v27 = vadd.f32 %v1253_v23, %v813_v26 }
 0x137   : > { %v1254_v28 = vpop.f32.mrb[4].mxu0 }
 0x138   : > { %v1255_v29 = vpop.f32.mrb[5].mxu0 }
 0x139   : > { %v1256_v30 = vadd.f32 %v1255_v29, %v1254_v28  ;;  %v1257_v31 = vpop.f32.mrb[6].mxu0  ;;  %v1334_v32 = vpop.f32.mrb[4].mxu1 }
 0x13a   : > { %v1258_v33 = vpop.f32.mrb[7].mxu0  ;;  %v826_v34 = vpop.f32.mrb[5].mxu1 }
 0x13b   : > { %v1737_v35 = vadd.f32 %v1330_v20, %v1256_v30  ;;  %v1259_v36 = vadd.f32 %v1258_v33, %v1257_v31  ;;  %v1335_v37 = vpop.f32.mrb[6].mxu1 }
 0x13c   : > { %v829_v38 = vpop.f32.mrb[7].mxu1 }
 0x13d   : > { %v1739_v39 = vadd.f32 %v1331_v25, %v1259_v36  ;;  %v878_v36 = vld [vmem:[%s1671_s27 + $0x8] sm:$0xff] (!%p1227_p12) }
 0x13f   : > { %v1260_v40 = vpop.f32.mrb[8].mxu0 }
 0x140   : > { %v1261_v41 = vpop.f32.mrb[9].mxu0 }
 0x141   : > { %v1262_v42 = vadd.f32 %v1261_v41, %v1260_v40  ;;  %v1263_v43 = vpop.f32.mrb[10].mxu0  ;;  %v1338_v44 = vpop.f32.mrb[8].mxu1  ;;  %v894_v40 = vadd.f32 (!%p1227_p12), %v878_v36, %v1735_v27 }
 0x142   : > { %v1264_v45 = vpop.f32.mrb[11].mxu0  ;;  %v842_v46 = vpop.f32.mrb[9].mxu1 }
 0x143   : > { %v1265_v47 = vadd.f32 %v1264_v45, %v1263_v43  ;;  %v1741_v48 = vadd.f32 %v1262_v42, %v826_v34  ;;  %v1339_v49 = vpop.f32.mrb[10].mxu1  ;;  %v877_v34 = vld [vmem:[%s1671_s27] sm:$0xff] (!%p1227_p12)  ;;  %v880_v42 = vld [vmem:[%s1671_s27 + $0x18] sm:$0xff] (!%p1227_p12)  ;;  %910 = vst [vmem:[#allocation2 + $0x8] sm:$0xff] (!%p1227_p12), %v894_v40 }
 0x144   : > { %v845_v50 = vpop.f32.mrb[11].mxu1  ;;  %v881_v43 = vld [vmem:[%s1671_s27 + $0x20] sm:$0xff] (!%p1227_p12)  ;;  %v896_v45 = vadd.f32 (!%p1227_p12), %v880_v42, %v1739_v39 }
 0x145   : > { %v1743_v51 = vadd.f32 %v1265_v47, %v829_v38  ;;  %v893_v38 = vadd.f32 (!%p1227_p12), %v877_v34, %v1733_v24 }
 0x146   : > { %912 = vst [vmem:[#allocation2 + $0x18] sm:$0xff] (!%p1227_p12), %v896_v45 }
 0x147   : > { %v1266_v52 = vpop.f32.mrb[12].mxu0  ;;  %909 = vst [vmem:[#allocation2] sm:$0xff] (!%p1227_p12), %v893_v38 }
 0x148   : > { %v1267_v53 = vpop.f32.mrb[13].mxu0 }
 0x149   : > { %v1268_v54 = vadd.f32 %v1267_v53, %v1266_v52  ;;  %v1269_v55 = vpop.f32.mrb[14].mxu0  ;;  %v1342_v56 = vpop.f32.mrb[12].mxu1  ;;  %v885_v52 = vld [vmem:[%s1671_s27 + $0x40] sm:$0xff] (!%p1227_p12) }
 0x14a   : > { %v1270_v57 = vpop.f32.mrb[15].mxu0  ;;  %v858_v58 = vpop.f32.mrb[13].mxu1 }
 0x14b   : > { %v1745_v59 = vadd.f32 %v1334_v32, %v1268_v54  ;;  %v1271_v60 = vadd.f32 %v1270_v57, %v1269_v55  ;;  %v1343_v61 = vpop.f32.mrb[14].mxu1  ;;  %v887_v57 = vld [vmem:[%s1671_s27 + $0x50] sm:$0xff] (!%p1227_p12) }
 0x14c   : > { %v861_v62 = vpop.f32.mrb[15].mxu1 }
 0x14d   : > { %v1747_v63 = vadd.f32 %v1335_v37, %v1271_v60  ;;  %v879_v37 = vld [vmem:[%s1671_s27 + $0x10] sm:$0xff] (!%p1227_p12) }
 0x14e   : > { %v895_v41 = vadd.f32 (!%p1227_p12), %v879_v37, %v1737_v35 }
 0x14f   : > { %v1272_v0 = vpop.f32.mrb[16].mxu0 }
 0x150   : > { %v1273_v1 = vpop.f32.mrb[17].mxu0  ;;  %911 = vst [vmem:[#allocation2 + $0x10] sm:$0xff] (!%p1227_p12), %v895_v41 }
 0x151   : > { %v1274_v2 = vadd.f32 %v1273_v1, %v1272_v0  ;;  %v1275_v3 = vpop.f32.mrb[18].mxu0  ;;  %v889_v0 = vld [vmem:[%s1671_s27 + $0x60] sm:$0xff] (!%p1227_p12)  ;;  %v890_v1 = vld [vmem:[%s1671_s27 + $0x68] sm:$0xff] (!%p1227_p12) }
 0x152   : > { %v1276_v4 = vpop.f32.mrb[19].mxu0 }
 0x153   : > { %v1277_v5 = vadd.f32 %v1276_v4, %v1275_v3  ;;  %v1749_v6 = vadd.f32 %v1274_v2, %v842_v46  ;;  %v897_v46 = vadd.f32 (!%p1227_p12), %v881_v43, %v1741_v48  ;;  %v891_v2 = vld [vmem:[%s1671_s27 + $0x70] sm:$0xff] (!%p1227_p12) }
 0x155   : > { %v1751_v7 = vadd.f32 %v1277_v5, %v845_v50  ;;  %v884_v50 = vld [vmem:[%s1671_s27 + $0x38] sm:$0xff] (!%p1227_p12)  ;;  %v901_v55 = vadd.f32 (!%p1227_p12), %v885_v52, %v1749_v6  ;;  %913 = vst [vmem:[#allocation2 + $0x20] sm:$0xff] (!%p1227_p12), %v897_v46 }
 0x156   : > { %v900_v54 = vadd.f32 (!%p1227_p12), %v884_v50, %v1747_v63 }
 0x157   : > { %v1278_v8 = vpop.f32.mrb[20].mxu0  ;;  %917 = vst [vmem:[#allocation2 + $0x40] sm:$0xff] (!%p1227_p12), %v901_v55 }
 0x158   : > { %v1279_v9 = vpop.f32.mrb[21].mxu0  ;;  %916 = vst [vmem:[#allocation2 + $0x38] sm:$0xff] (!%p1227_p12), %v900_v54 }
 0x159   : > { %v1280_v10 = vadd.f32 %v1279_v9, %v1278_v8  ;;  %v1281_v11 = vpop.f32.mrb[22].mxu0  ;;  %v892_v8 = vld [vmem:[%s1671_s27 + $0x78] sm:$0xff] (!%p1227_p12) }
 0x15a   : > { %v1282_v12 = vpop.f32.mrb[23].mxu0 }
 0x15b   : > { %v1753_v13 = vadd.f32 %v1338_v44, %v1280_v10  ;;  %v1283_v14 = vadd.f32 %v1282_v12, %v1281_v11  ;;  %v882_v44 = vld [vmem:[%s1671_s27 + $0x28] sm:$0xff] (!%p1227_p12) }
 0x15c   : > { %v898_v47 = vadd.f32 (!%p1227_p12), %v882_v44, %v1743_v51 }
 0x15d   : > { %v1755_v15 = vadd.f32 %v1339_v49, %v1283_v14  ;;  %v883_v49 = vld [vmem:[%s1671_s27 + $0x30] sm:$0xff] (!%p1227_p12) }
 0x15e   : > { %v899_v53 = vadd.f32 (!%p1227_p12), %v883_v49, %v1745_v59  ;;  %914 = vst [vmem:[#allocation2 + $0x28] sm:$0xff] (!%p1227_p12), %v898_v47 }
 0x15f   : > { %v1284_v16 = vpop.f32.mrb[24].mxu0 }
 0x160   : > { %v1285_v17 = vpop.f32.mrb[25].mxu0  ;;  %915 = vst [vmem:[#allocation2 + $0x30] sm:$0xff] (!%p1227_p12), %v899_v53 }
 0x161   : > { %v1286_v18 = vadd.f32 %v1285_v17, %v1284_v16  ;;  %v1287_v19 = vpop.f32.mrb[26].mxu0 }
 0x162   : > { %v1288_v20 = vpop.f32.mrb[27].mxu0 }
 0x163   : > { %v1289_v21 = vadd.f32 %v1288_v20, %v1287_v19  ;;  %v1757_v22 = vadd.f32 %v1286_v18, %v858_v58  ;;  %v888_v58 = vld [vmem:[%s1671_s27 + $0x58] sm:$0xff] (!%p1227_p12) }
 0x165   : > { %v1759_v23 = vadd.f32 %v1289_v21, %v861_v62  ;;  %v904_v62 = vadd.f32 (!%p1227_p12), %v888_v58, %v1755_v15  ;;  %v905_v3 = vadd.f32 (!%p1227_p12), %v889_v0, %v1757_v22 }
 0x167   : > { %v1290_v25 = vpop.f32.mrb[28].mxu0  ;;  %876 = sbr.rel (%p1227_p12) target bundleno = 370 (0x172), region = 62  ;;  %v906_v4 = vadd.f32 (!%p1227_p12), %v890_v1, %v1759_v23  ;;  %920 = vst [vmem:[#allocation2 + $0x58] sm:$0xff] (!%p1227_p12), %v904_v62  ;;  %921 = vst [vmem:[#allocation2 + $0x60] sm:$0xff] (!%p1227_p12), %v905_v3 }
 0x168   : > { %v1291_v26 = vpop.f32.mrb[29].mxu0 }
 0x169   : > { %v1292_v28 = vadd.f32 %v1291_v26, %v1290_v25  ;;  %v1293_v29 = vpop.f32.mrb[30].mxu0  ;;  %922 = vst [vmem:[#allocation2 + $0x68] sm:$0xff] (!%p1227_p12), %v906_v4 }
 0x16a   : > { %v1294_v30 = vpop.f32.mrb[31].mxu0 }
 0x16b   : > { %v1761_v31 = vadd.f32 %v1342_v56, %v1292_v28  ;;  %v1295_v32 = vadd.f32 %v1294_v30, %v1293_v29  ;;  %v886_v56 = vld [vmem:[%s1671_s27 + $0x48] sm:$0xff] (!%p1227_p12) }
 0x16c   : > { %v902_v60 = vadd.f32 (!%p1227_p12), %v886_v56, %v1751_v7 }
 0x16d   : > { %v1763_v33 = vadd.f32 %v1343_v61, %v1295_v32  ;;  %v903_v61 = vadd.f32 (!%p1227_p12), %v887_v57, %v1753_v13  ;;  %v907_v5 = vadd.f32 (!%p1227_p12), %v891_v2, %v1761_v31 }
 0x16e   : > { %918 = vst [vmem:[#allocation2 + $0x48] sm:$0xff] %v902_v60 }
 0x16f   : > { %919 = vst [vmem:[#allocation2 + $0x50] sm:$0xff] %v903_v61  ;;  %v908_v9 = vadd.f32 %v892_v8, %v1763_v33  ;;  %923 = vst [vmem:[#allocation2 + $0x70] sm:$0xff] %v907_v5 }
 0x171   : > { %924 = vst [vmem:[#allocation2 + $0x78] sm:$0xff] %v908_v9 }
 0x172 PF: > { %p1228_p13 = scmp.le.s32.totalorder %s1497_s14, 0 }
 0x173   : > { %v929_v10 = vld [vmem:[#allocation2] sm:$0xff] (!%p1228_p13)  ;;  %v930_v11 = vld [vmem:[#allocation2 + $0x8] sm:$0xff] (!%p1228_p13)  ;;  %v931_v12 = vld [vmem:[#allocation2 + $0x10] sm:$0xff] (!%p1228_p13) }
 0x174   : > { %928 = sbr.rel (%p1228_p13) target bundleno = 382 (0x17e), region = 66  ;;  %v945_v14 = vadd.f32 (!%p1228_p13), %v929_v10, %v1733_v24  ;;  %v946_v16 = vadd.f32 (!%p1228_p13), %v930_v11, %v1735_v27  ;;  %v947_v17 = vadd.f32 (!%p1228_p13), %v931_v12, %v1737_v35  ;;  %v932_v18 = vld [vmem:[#allocation2 + $0x18] sm:$0xff] (!%p1228_p13)  ;;  %v933_v19 = vld [vmem:[#allocation2 + $0x20] sm:$0xff] (!%p1228_p13)  ;;  %v934_v20 = vld [vmem:[#allocation2 + $0x28] sm:$0xff] (!%p1228_p13) }
 0x175   : > { %v948_v21 = vadd.f32 (!%p1228_p13), %v932_v18, %v1739_v39  ;;  %v949_v25 = vadd.f32 (!%p1228_p13), %v933_v19, %v1741_v48  ;;  %v950_v26 = vadd.f32 (!%p1228_p13), %v934_v20, %v1743_v51  ;;  %v935_v28 = vld [vmem:[#allocation2 + $0x30] sm:$0xff] (!%p1228_p13)  ;;  %v936_v29 = vld [vmem:[#allocation2 + $0x38] sm:$0xff] (!%p1228_p13)  ;;  %v937_v30 = vld [vmem:[#allocation2 + $0x40] sm:$0xff] (!%p1228_p13) }
 0x176   : > { %961 = vst [vmem:[#allocation2] sm:$0xff] (!%p1228_p13), %v945_v14  ;;  %962 = vst [vmem:[#allocation2 + $0x8] sm:$0xff] (!%p1228_p13), %v946_v16  ;;  %v951_v24 = vadd.f32 (!%p1228_p13), %v935_v28, %v1745_v59  ;;  %v952_v27 = vadd.f32 (!%p1228_p13), %v936_v29, %v1747_v63  ;;  %v953_v35 = vadd.f32 (!%p1228_p13), %v937_v30, %v1749_v6  ;;  %v939_v34 = vld [vmem:[#allocation2 + $0x50] sm:$0xff] (!%p1228_p13)  ;;  %v940_v36 = vld [vmem:[#allocation2 + $0x58] sm:$0xff] (!%p1228_p13) }
 0x177   : > { %963 = vst [vmem:[#allocation2 + $0x10] sm:$0xff] (!%p1228_p13), %v947_v17  ;;  %964 = vst [vmem:[#allocation2 + $0x18] sm:$0xff] (!%p1228_p13), %v948_v21  ;;  %v955_v48 = vadd.f32 (!%p1228_p13), %v939_v34, %v1753_v13  ;;  %v956_v51 = vadd.f32 (!%p1228_p13), %v940_v36, %v1755_v15  ;;  %v941_v37 = vld [vmem:[#allocation2 + $0x60] sm:$0xff] (!%p1228_p13)  ;;  %v942_v38 = vld [vmem:[#allocation2 + $0x68] sm:$0xff] (!%p1228_p13) }
 0x178   : > { %965 = vst [vmem:[#allocation2 + $0x20] sm:$0xff] (!%p1228_p13), %v949_v25  ;;  %966 = vst [vmem:[#allocation2 + $0x28] sm:$0xff] (!%p1228_p13), %v950_v26  ;;  %v943_v40 = vld [vmem:[#allocation2 + $0x70] sm:$0xff] (!%p1228_p13)  ;;  %v957_v59 = vadd.f32 (!%p1228_p13), %v941_v37, %v1757_v22  ;;  %v958_v63 = vadd.f32 (!%p1228_p13), %v942_v38, %v1759_v23  ;;  %v944_v41 = vld [vmem:[#allocation2 + $0x78] sm:$0xff] (!%p1228_p13) }
 0x179   : > { %v938_v32 = vld [vmem:[#allocation2 + $0x48] sm:$0xff] (!%p1228_p13)  ;;  %967 = vst [vmem:[#allocation2 + $0x30] sm:$0xff] (!%p1228_p13), %v951_v24  ;;  %968 = vst [vmem:[#allocation2 + $0x38] sm:$0xff] (!%p1228_p13), %v952_v27  ;;  %v959_v6 = vadd.f32 (!%p1228_p13), %v943_v40, %v1761_v31 }
 0x17a   : > { %v954_v39 = vadd.f32 (!%p1228_p13), %v938_v32, %v1751_v7  ;;  %969 = vst [vmem:[#allocation2 + $0x40] sm:$0xff] (!%p1228_p13), %v953_v35  ;;  %971 = vst [vmem:[#allocation2 + $0x50] sm:$0xff] (!%p1228_p13), %v955_v48  ;;  %v960_v7 = vadd.f32 (!%p1228_p13), %v944_v41, %v1763_v33 }
 0x17b   : > { %972 = vst [vmem:[#allocation2 + $0x58] sm:$0xff] %v956_v51  ;;  %973 = vst [vmem:[#allocation2 + $0x60] sm:$0xff] %v957_v59 }
 0x17c   : > { %970 = vst [vmem:[#allocation2 + $0x48] sm:$0xff] %v954_v39  ;;  %974 = vst [vmem:[#allocation2 + $0x68] sm:$0xff] %v958_v63 }
 0x17d   : > { %975 = vst [vmem:[#allocation2 + $0x70] sm:$0xff] %v959_v6  ;;  %976 = vst [vmem:[#allocation2 + $0x78] sm:$0xff] %v960_v7 }
 0x17e PF: > { %p1229_p0 = scmp.ne.s32.totalorder %s1497_s14, 1 }
 0x180   : > { %980 = sbr.rel (%p1229_p0) target bundleno = 396 (0x18c), region = 70  ;;  %v981_v13 = vld [vmem:[#allocation2] sm:$0xff] (!%p1229_p0)  ;;  %v982_v15 = vld [vmem:[#allocation2 + $0x8] sm:$0xff] (!%p1229_p0) }
 0x181   : > { %v983_v22 = vld [vmem:[#allocation2 + $0x10] sm:$0xff] (!%p1229_p0)  ;;  %v997_v23 = vmax.f32 (!%p1229_p0), %v981_v13, 0.0  ;;  %v998_v31 = vmax.f32 (!%p1229_p0), %v982_v15, 0.0  ;;  %v984_v43 = vld [vmem:[#allocation2 + $0x18] sm:$0xff] (!%p1229_p0) }
 0x182   : > { %v999_v42 = vmax.f32 (!%p1229_p0), %v983_v22, 0.0  ;;  %v985_v44 = vld [vmem:[#allocation2 + $0x20] sm:$0xff] (!%p1229_p0)  ;;  %v986_v33 = vld [vmem:[#allocation2 + $0x28] sm:$0xff] (!%p1229_p0)  ;;  %v1000_v45 = vmax.f32 (!%p1229_p0), %v984_v43, 0.0 }
 0x183   : > { %v1001_v46 = vmax.f32 (!%p1229_p0), %v985_v44, 0.0  ;;  %v1002_v47 = vmax.f32 (!%p1229_p0), %v986_v33, 0.0  ;;  %v987_v49 = vld [vmem:[#allocation2 + $0x30] sm:$0xff] (!%p1229_p0)  ;;  %v988_v50 = vld [vmem:[#allocation2 + $0x38] sm:$0xff] (!%p1229_p0)  ;;  %1013 = vst [vmem:[%s1683_s5] sm:$0xff] (!%p1229_p0), %v997_v23  ;;  %1014 = vst [vmem:[%s1683_s5 + $0x8] sm:$0xff] (!%p1229_p0), %v998_v31 }
 0x184   : > { %v989_v52 = vld [vmem:[#allocation2 + $0x40] sm:$0xff] (!%p1229_p0)  ;;  %1015 = vst [vmem:[%s1683_s5 + $0x10] sm:$0xff] (!%p1229_p0), %v999_v42  ;;  %v1003_v53 = vmax.f32 (!%p1229_p0), %v987_v49, 0.0  ;;  %v1004_v54 = vmax.f32 (!%p1229_p0), %v988_v50, 0.0  ;;  %v990_v56 = vld [vmem:[#allocation2 + $0x48] sm:$0xff] (!%p1229_p0)  ;;  %v991_v57 = vld [vmem:[#allocation2 + $0x50] sm:$0xff] (!%p1229_p0) }
 0x185   : > { %v1005_v55 = vmax.f32 (!%p1229_p0), %v989_v52, 0.0  ;;  %v992_v58 = vld [vmem:[#allocation2 + $0x58] sm:$0xff] (!%p1229_p0)  ;;  %1016 = vst [vmem:[%s1683_s5 + $0x18] sm:$0xff] (!%p1229_p0), %v1000_v45  ;;  %1017 = vst [vmem:[%s1683_s5 + $0x20] sm:$0xff] (!%p1229_p0), %v1001_v46  ;;  %v1006_v60 = vmax.f32 (!%p1229_p0), %v990_v56, 0.0  ;;  %v1007_v61 = vmax.f32 (!%p1229_p0), %v991_v57, 0.0 }
 0x186   : > { %1018 = vst [vmem:[%s1683_s5 + $0x28] sm:$0xff] (!%p1229_p0), %v1002_v47  ;;  %v1008_v62 = vmax.f32 (!%p1229_p0), %v992_v58, 0.0  ;;  %v993_v0 = vld [vmem:[#allocation2 + $0x60] sm:$0xff] (!%p1229_p0)  ;;  %v994_v1 = vld [vmem:[#allocation2 + $0x68] sm:$0xff] (!%p1229_p0)  ;;  %v995_v2 = vld [vmem:[#allocation2 + $0x70] sm:$0xff] (!%p1229_p0) }
 0x187   : > { %1019 = vst [vmem:[%s1683_s5 + $0x30] sm:$0xff] %v1003_v53  ;;  %1020 = vst [vmem:[%s1683_s5 + $0x38] sm:$0xff] %v1004_v54  ;;  %v1009_v3 = vmax.f32 %v993_v0, 0.0  ;;  %v1010_v4 = vmax.f32 %v994_v1, 0.0  ;;  %v1011_v5 = vmax.f32 %v995_v2, 0.0  ;;  %v996_v8 = vld [vmem:[#allocation2 + $0x78] sm:$0xff] }
 0x188   : > { %1021 = vst [vmem:[%s1683_s5 + $0x40] sm:$0xff] %v1005_v55  ;;  %1022 = vst [vmem:[%s1683_s5 + $0x48] sm:$0xff] %v1006_v60  ;;  %v1012_v9 = vmax.f32 %v996_v8, 0.0 }
 0x189   : > { %1023 = vst [vmem:[%s1683_s5 + $0x50] sm:$0xff] %v1007_v61  ;;  %1024 = vst [vmem:[%s1683_s5 + $0x58] sm:$0xff] %v1008_v62 }
 0x18a   : > { %1025 = vst [vmem:[%s1683_s5 + $0x60] sm:$0xff] %v1009_v3  ;;  %1026 = vst [vmem:[%s1683_s5 + $0x68] sm:$0xff] %v1010_v4 }
 0x18b   : > { %1027 = vst [vmem:[%s1683_s5 + $0x70] sm:$0xff] %v1011_v5  ;;  %1028 = vst [vmem:[%s1683_s5 + $0x78] sm:$0xff] %v1012_v9 }
 0x18c PF: > { %s13_s18 = sadd.s32 1, %s1513_s18   ;;  %s1857_s12 = smov %s1493_s13 }
 0x18d   : > { %p10_p1 = scmp.ge.s32.totalorder %s13_s18, 6   ;;  %s1858_s13 = smov %s1586_s25 }
 0x18e   : > { %s1859_s14 = smov %s1505_s16  ;;  %s1860_s15 = smov %s1509_s17 }
 0x18f   : > { %s1861_s16 = smov %s1864_s19  ;;  %s1862_s17 = smov %s1868_s20 }
 0x190   :  { %12 = sbr.rel (!%p10_p1) target bundleno = 4 (0x4), region = 117 }

// kernel: _rgcn_node_forward_impl.3
= control target key start
LH: loop header
LB: loop body
LE: loop exit
PB: predicated region body
PF: predicated region fallthrough
CT: control target
= control target key end

     0   :  { %s1778_s12 = smov 0   ;;  %s1780_s13 = smov 0   ;;  %s2200_s0 = inlined_call_operand.vmem [shape: bf16[256,768], index: 0, kind: input, shape index: {}]   ;;  %s2201_s1 = inlined_call_operand.vmem [shape: bf16[768,128], index: 1, kind: input, shape index: {}]   ;;  %s2202_s2 = inlined_call_operand.vmem [shape: f32[256,128], index: 2, kind: input, shape index: {}]   ;;  %s2203_s3 = inlined_call_operand.vmem [shape: f32[256,128], index: 3, kind: output, shape index: {}]  }
   0x1   :  { %s1782_s14 = smov 0   ;;  %s1784_s15 = smov 0  }
   0x2   :  { %s1786_s16 = smov 0   ;;  %s1788_s17 = smov 0  }
   0x3   :  { %s1790_s18 = smov 0  }
   0x4 LB: > { %s22_s19 = sadd.s32 1, %s1748_s16  ;;  %s25_s20 = sadd.s32 1, %s1752_s17  ;;  %s1756_s18 = sphi %s1790_s18, %s13_s18   ;;  %s1752_s17 = sphi %s1788_s17, %s2209_s17   ;;  %s1748_s16 = sphi %s1786_s16, %s2208_s16   ;;  %s1744_s15 = sphi %s1784_s15, %s2207_s15   ;;  %s1740_s14 = sphi %s1782_s14, %s2206_s14   ;;  %s1736_s13 = sphi %s1780_s13, %s2205_s13   ;;  %s1732_s12 = sphi %s1778_s12, %s2204_s12  }
   0x5   : > { %p23_p0 = scmp.ge.s32.totalorder %s22_s19, 2  ;;  %p41_p1 = scmp.ne.s32.totalorder %s1736_s13, %s1732_s12 }
   0x6   : > { %p42_p2 = scmp.eq.s32.totalorder %s1756_s18, 0  ;;  %s34_s24 = sadd.s32 1, %s1736_s13 }
   0x7   : > { %s2211_s19 = smov (%p23_p0, %s22_s19), 0  ;;  %s2213_s20 = smov (!%p23_p0, %s25_s20), %s1752_s17 }
   0x8   : > { %p43_p3 = por %p42_p2, %p41_p1  ;;  %p27_p4 = scmp.ge.s32.totalorder %s2213_s20, 2 }
   0x9   : > { %s30_s21 = ssub.s32 %s1748_s16, %s2211_s19  ;;  %p1316_p6 = scmp.ge.s32.totalorder %s1756_s18, 4 }
   0xa   : > { %s2215_s20 = smov (%p27_p4, %s2213_s20), 0 }
   0xb   : > { %s29_s22 = ssub.s32 %s1752_s17, %s2215_s20  ;;  %145 = sbr.rel (%p1316_p6) target bundleno = 45 (0x2d), region = 16 }
   0xc   : > { %s31_s23 = sor.u32 %s30_s21, %s29_s22 }
   0xd   : > { %p32_p5 = scmp.eq.s32.totalorder %s31_s23, 0 }
   0xf   : > { %s1829_s25 = scalar_select %p32_p5, %s1736_s13, %s34_s24  }
  0x12   : > { %148 = sbr.rel (!%p43_p3) target bundleno = 45 (0x2d), region = 20  ;;  %s150_s26 = sand.u32 (%p43_p3), 1, %s1736_s13  }
  0x13   : > { %s154_s27 = smul.u32 (%p43_p3), 3, %s1748_s16 }
  0x14   : > { %s1523_s28 = smul.u32 (%p43_p3), 192, %s150_s26 }
  0x15   : > { %s1524_s29 = smul.u32 (%p43_p3), 96, %s1752_s17 }
  0x16   : > { %s1843_s8 = scalar_lea.vmem (%p43_p3), [#allocation3], %s1523_s28 }
  0x17   : > { %s156_s30 = sadd.s32 (%p43_p3), %s1524_s29, %s154_s27 }
  0x18   : > { %s1319_s4 = sshll.u32 (%p43_p3), %s156_s30, 2 }
  0x19   : > { %s1838_s7 = scalar_lea.vmem %s2200_s0, %s1319_s4 }
  0x1a   : > { %v173_v0 = vld [vmem:[%s1838_s7] sm:$0xff]  ;;  %v175_v1 = vld [vmem:[%s1838_s7 + $0x18] sm:$0xff]  ;;  %v177_v2 = vld [vmem:[%s1838_s7 + $0x30] sm:$0xff] }
  0x1b   : > { %174 = vst [vmem:[%s1843_s8] sm:$0xff] %v173_v0  ;;  %176 = vst [vmem:[%s1843_s8 + $0xc] sm:$0xff] %v175_v1  ;;  %v179_v3 = vld [vmem:[%s1838_s7 + $0x48] sm:$0xff]  ;;  %v181_v4 = vld [vmem:[%s1838_s7 + $0x60] sm:$0xff] }
  0x1c   : > { %178 = vst [vmem:[%s1843_s8 + $0x18] sm:$0xff] %v177_v2  ;;  %v183_v5 = vld [vmem:[%s1838_s7 + $0x78] sm:$0xff]  ;;  %180 = vst [vmem:[%s1843_s8 + $0x24] sm:$0xff] %v179_v3  ;;  %v185_v6 = vld [vmem:[%s1838_s7 + $0x90] sm:$0xff] }
  0x1d   : > { %182 = vst [vmem:[%s1843_s8 + $0x30] sm:$0xff] %v181_v4  ;;  %184 = vst [vmem:[%s1843_s8 + $0x3c] sm:$0xff] %v183_v5  ;;  %v187_v7 = vld [vmem:[%s1838_s7 + $0xa8] sm:$0xff]  ;;  %v189_v8 = vld [vmem:[%s1838_s7 + $0xc0] sm:$0xff] }
  0x1e   : > { %186 = vst [vmem:[%s1843_s8 + $0x48] sm:$0xff] %v185_v6  ;;  %188 = vst [vmem:[%s1843_s8 + $0x54] sm:$0xff] %v187_v7  ;;  %v191_v9 = vld [vmem:[%s1838_s7 + $0xd8] sm:$0xff]  ;;  %v193_v10 = vld [vmem:[%s1838_s7 + $0xf0] sm:$0xff] }
  0x1f   : > { %190 = vst [vmem:[%s1843_s8 + $0x60] sm:$0xff] %v189_v8  ;;  %v195_v11 = vld [vmem:[%s1838_s7 + $0x108] sm:$0xff]  ;;  %192 = vst [vmem:[%s1843_s8 + $0x6c] sm:$0xff] %v191_v9  ;;  %v197_v12 = vld [vmem:[%s1838_s7 + $0x120] sm:$0xff] }
  0x20   : > { %194 = vst [vmem:[%s1843_s8 + $0x78] sm:$0xff] %v193_v10  ;;  %196 = vst [vmem:[%s1843_s8 + $0x84] sm:$0xff] %v195_v11  ;;  %v199_v13 = vld [vmem:[%s1838_s7 + $0x138] sm:$0xff]  ;;  %v201_v14 = vld [vmem:[%s1838_s7 + $0x150] sm:$0xff] }
  0x21   : > { %198 = vst [vmem:[%s1843_s8 + $0x90] sm:$0xff] %v197_v12  ;;  %200 = vst [vmem:[%s1843_s8 + $0x9c] sm:$0xff] %v199_v13  ;;  %v203_v15 = vld [vmem:[%s1838_s7 + $0x168] sm:$0xff]  ;;  %v1322_v17 = vld [vmem:[%s1838_s7 + $0x20] sm:$0xf] }
  0x22   : > { %202 = vst [vmem:[%s1843_s8 + $0xa8] sm:$0xff] %v201_v14  ;;  %v1320_v16 = vld [vmem:[%s1838_s7 + $0x8] sm:$0xf]  ;;  %204 = vst [vmem:[%s1843_s8 + $0xb4] sm:$0xff] %v203_v15  ;;  %v1324_v18 = vld [vmem:[%s1838_s7 + $0x38] sm:$0xf] }
  0x23   : > { %1321 = vst [vmem:[%s1843_s8 + $0x8] sm:$0xf] %v1320_v16  ;;  %1323 = vst [vmem:[%s1843_s8 + $0x14] sm:$0xf] %v1322_v17  ;;  %v1326_v19 = vld [vmem:[%s1838_s7 + $0x50] sm:$0xf] }
  0x24   : > { %v1328_v20 = vld [vmem:[%s1838_s7 + $0x68] sm:$0xf]  ;;  %1325 = vst [vmem:[%s1843_s8 + $0x20] sm:$0xf] %v1324_v18  ;;  %1327 = vst [vmem:[%s1843_s8 + $0x2c] sm:$0xf] %v1326_v19 }
  0x25   : > { %1329 = vst [vmem:[%s1843_s8 + $0x38] sm:$0xf] %v1328_v20  ;;  %v1330_v21 = vld [vmem:[%s1838_s7 + $0x80] sm:$0xf]  ;;  %v1332_v22 = vld [vmem:[%s1838_s7 + $0x98] sm:$0xf] }
  0x26   : > { %v1334_v23 = vld [vmem:[%s1838_s7 + $0xb0] sm:$0xf]  ;;  %1331 = vst [vmem:[%s1843_s8 + $0x44] sm:$0xf] %v1330_v21  ;;  %1333 = vst [vmem:[%s1843_s8 + $0x50] sm:$0xf] %v1332_v22 }
  0x27   : > { %1335 = vst [vmem:[%s1843_s8 + $0x5c] sm:$0xf] %v1334_v23  ;;  %v1336_v24 = vld [vmem:[%s1838_s7 + $0xc8] sm:$0xf]  ;;  %v1338_v25 = vld [vmem:[%s1838_s7 + $0xe0] sm:$0xf] }
  0x28   : > { %v1340_v26 = vld [vmem:[%s1838_s7 + $0xf8] sm:$0xf]  ;;  %1337 = vst [vmem:[%s1843_s8 + $0x68] sm:$0xf] %v1336_v24  ;;  %1339 = vst [vmem:[%s1843_s8 + $0x74] sm:$0xf] %v1338_v25 }
  0x29   : > { %1341 = vst [vmem:[%s1843_s8 + $0x80] sm:$0xf] %v1340_v26  ;;  %v1342_v27 = vld [vmem:[%s1838_s7 + $0x110] sm:$0xf]  ;;  %v1344_v28 = vld [vmem:[%s1838_s7 + $0x128] sm:$0xf] }
  0x2a   : > { %v1346_v29 = vld [vmem:[%s1838_s7 + $0x140] sm:$0xf]  ;;  %1343 = vst [vmem:[%s1843_s8 + $0x8c] sm:$0xf] %v1342_v27  ;;  %1345 = vst [vmem:[%s1843_s8 + $0x98] sm:$0xf] %v1344_v28 }
  0x2b   : > { %1347 = vst [vmem:[%s1843_s8 + $0xa4] sm:$0xf] %v1346_v29  ;;  %v1348_v30 = vld [vmem:[%s1838_s7 + $0x158] sm:$0xf]  ;;  %v1350_v31 = vld [vmem:[%s1838_s7 + $0x170] sm:$0xf] }
  0x2c   : > { %1349 = vst [vmem:[%s1843_s8 + $0xb0] sm:$0xf] %v1348_v30  ;;  %1351 = vst [vmem:[%s1843_s8 + $0xbc] sm:$0xf] %v1350_v31 }
  0x2d PF: > { %p1352_p7 = scmp.ge.s32.totalorder %s1756_s18, 1  ;;  %p266_p8 = scmp.lt.s32.totalorder %s1756_s18, 5 }
  0x2f   : > { %p267_p9 = pnand %p1352_p7, %p266_p8 }
  0x30   : > { %s308_s9 = smul.u32 (!%p267_p9), 48, %s1740_s14  ;;  %s1354_s10 = sshll.u32 (!%p267_p9), %s1744_s15, 4 }
  0x31   : > { %270 = sbr.rel (%p267_p9) target bundleno = 736 (0x2e0), region = 54  ;;  %p315_p10 = scmp.lt.s32.totalorder (!%p267_p9), %s1354_s10, 31 }
  0x32   : > { %s273_s11 = sand.u32 (!%p267_p9), 1, %s1732_s12   ;;  %p309_p11 = scmp.lt.s32.totalorder (!%p267_p9), %s308_s9, 95 }
  0x33   : > { %s1525_s21 = smul.u32 (!%p267_p9), 192, %s273_s11  ;;  %p1406_p12 = scmp.ne.s32.totalorder (!%p267_p9), %s1740_s14, 0 }
  0x35   : > { %s1916_s28 = scalar_lea.vmem (!%p267_p9), [#allocation3], %s1525_s21 }
  0x36   : > { %v1608_v32 = vld [vmem:[%s1916_s28 + $0x4] ss:$12 sps:$4 sm:$0xff] (!%p267_p9)   ;;  %v1609_v55 = vld [vmem:[%s1916_s28 + $0x8] ss:$12 sps:$4 sm:$0xff] (!%p267_p9)   ;;  %v1606_v58 = vld [vmem:[%s1916_s28] ss:$12 sps:$4 sm:$0xff] (!%p267_p9)  }
  0x37   : > { %711 = vmatprep.mubr.bf16.mxu0 (!%p267_p9), %v1608_v32  ;;  %1507 = vmatprep.mubr.bf16.mxu1 (!%p267_p9), %v1609_v55  ;;  %v1611_v59 = vld [vmem:[%s1916_s28 + $0x1c] ss:$12 sps:$4 sm:$0xff] (!%p267_p9)   ;;  %v1610_v60 = vld [vmem:[%s1916_s28 + $0x20] ss:$12 sps:$4 sm:$0xff] (!%p267_p9)   ;;  %v1617_v61 = vld [vmem:[%s1916_s28 + $0x38] ss:$12 sps:$4 sm:$0xff] (!%p267_p9)  }
  0x38   : > { %s2217_s10 = smov (!%p315_p10, %s1354_s10), 31  ;;  %s2219_s9 = smov (!%p309_p11, %s308_s9), 95  ;;  %v1613_v62 = vld [vmem:[%s1916_s28 + $0x18] ss:$12 sps:$4 sm:$0xff]   ;;  %v1614_v63 = vld [vmem:[%s1916_s28 + $0x34] ss:$12 sps:$4 sm:$0xff]  }
  0x39   : > { %s1355_s22 = sshll.u32 %s2217_s10, 3  ;;  %s1353_s23 = sshll.u32 %s2219_s9, 2  ;;  %v1618_v0 = vld [vmem:[%s1916_s28 + $0x50] ss:$12 sps:$4 sm:$0xff]   ;;  %v1625_v1 = vld [vmem:[%s1916_s28 + $0x68] ss:$12 sps:$4 sm:$0xff]  }
  0x3a   : > { %s1914_s27 = scalar_lea.vmem %s2202_s2, %s1355_s22  ;;  %s1921_s15 = scalar_lea.vmem %s2201_s1, %s1353_s23  ;;  %v1616_v2 = vld [vmem:[%s1916_s28 + $0x30] ss:$12 sps:$4 sm:$0xff]   ;;  %v1619_v3 = vld [vmem:[%s1916_s28 + $0x4c] ss:$12 sps:$4 sm:$0xff]   ;;  %v1621_v6 = vld [vmem:[%s1916_s28 + $0x48] ss:$12 sps:$4 sm:$0xff]  }
  0x3b   : > { %s1926_s5 = scalar_lea.vmem %s2203_s3, %s1355_s22  ;;  %v1582_v33 = vld [vmem:[%s1921_s15 + $0x40] sm:$0xff]   ;;  %v1585_v36 = vld [vmem:[%s1921_s15 + $0x48] sm:$0xff]   ;;  %v1588_v39 = vld [vmem:[%s1921_s15 + $0x50] sm:$0xff]  }
  0x3c   : > { %v1583_v34 = vld [vmem:[%s1921_s15] sm:$0xff]   ;;  %1411 = vmatprep.subr.bf16.mxu0 %v1582_v33  ;;  %v1586_v37 = vld [vmem:[%s1921_s15 + $0x8] sm:$0xff]   ;;  %v1589_v40 = vld [vmem:[%s1921_s15 + $0x10] sm:$0xff]  }
  0x3d   : > { %v1584_v35 = vld [vmem:[%s1921_s15 + $0x80] sm:$0xff]   ;;  %1412 = vmatpush3.bf16.msra.mxu0 %v1583_v34  ;;  %v1587_v38 = vld [vmem:[%s1921_s15 + $0x88] sm:$0xff]   ;;  %v1590_v41 = vld [vmem:[%s1921_s15 + $0x90] sm:$0xff]  }
  0x3e   : > { %1491 = vmatprep.subr.bf16.mxu1 %v1584_v35  ;;  %1413 = vmatprep.subr.bf16.mxu0 %v1585_v36  ;;  %v1591_v42 = vld [vmem:[%s1921_s15 + $0x58] sm:$0xff]   ;;  %v1594_v45 = vld [vmem:[%s1921_s15 + $0x60] sm:$0xff]   ;;  %v1597_v48 = vld [vmem:[%s1921_s15 + $0x68] sm:$0xff]  }
  0x3f   : > { %1492 = vmatpush3.bf16.msra.mxu1 %v1584_v35  ;;  %v1592_v43 = vld [vmem:[%s1921_s15 + $0x18] sm:$0xff]   ;;  %v1596_v46 = vld [vmem:[%s1921_s15 + $0xa0] sm:$0xff]   ;;  %v1599_v49 = vld [vmem:[%s1921_s15 + $0xa8] sm:$0xff]  }
  0x40   : > { %1493 = vmatprep.subr.bf16.mxu1 %v1587_v38  ;;  %v1593_v44 = vld [vmem:[%s1921_s15 + $0x98] sm:$0xff]   ;;  %v1595_v47 = vld [vmem:[%s1921_s15 + $0x20] sm:$0xff]   ;;  %v1598_v50 = vld [vmem:[%s1921_s15 + $0x28] sm:$0xff]  }
  0x41   : > { %1414 = vmatpush3.bf16.msra.mxu0 %v1586_v37  ;;  %v1600_v51 = vld [vmem:[%s1921_s15 + $0x70] sm:$0xff]   ;;  %v1603_v54 = vld [vmem:[%s1921_s15 + $0x78] sm:$0xff]   ;;  %v1626_v4 = vld [vmem:[%s1916_s28 + $0x80] ss:$12 sps:$4 sm:$0xff]  }
  0x42   : > { %1415 = vmatprep.subr.bf16.mxu0 %v1588_v39  ;;  %v1601_v52 = vld [vmem:[%s1921_s15 + $0x30] sm:$0xff]   ;;  %v1605_v56 = vld [vmem:[%s1921_s15 + $0xb8] sm:$0xff]   ;;  %v1624_v9 = vld [vmem:[%s1916_s28 + $0x60] ss:$12 sps:$4 sm:$0xff]  }
  0x43   : > { %1494 = vmatpush3.bf16.msra.mxu1 %v1587_v38  ;;  %v1602_v53 = vld [vmem:[%s1921_s15 + $0xb0] sm:$0xff]   ;;  %v1604_v57 = vld [vmem:[%s1921_s15 + $0x38] sm:$0xff]  }
  0x44   : > { %1495 = vmatprep.subr.bf16.mxu1 %v1590_v41  ;;  %v1633_v5 = vld [vmem:[%s1916_s28 + $0x98] ss:$12 sps:$4 sm:$0xff]   ;;  %v1634_v8 = vld [vmem:[%s1916_s28 + $0xb0] ss:$12 sps:$4 sm:$0xff]   ;;  %v1630_v12 = vld [vmem:[%s1916_s28 + $0x94] ss:$12 sps:$4 sm:$0xff]  }
  0x45   : > { %1416 = vmatpush3.bf16.msra.mxu0 %v1589_v40  ;;  %v1622_v7 = vld [vmem:[%s1916_s28 + $0x64] ss:$12 sps:$4 sm:$0xff]   ;;  %v1627_v10 = vld [vmem:[%s1916_s28 + $0x7c] ss:$12 sps:$4 sm:$0xff]   ;;  %v1635_v14 = vld [vmem:[%s1916_s28 + $0xac] ss:$12 sps:$4 sm:$0xff]  }
  0x46   : > { %1417 = vmatprep.subr.bf16.mxu0 %v1591_v42  ;;  %v1629_v11 = vld [vmem:[%s1916_s28 + $0x78] ss:$12 sps:$4 sm:$0xff]   ;;  %v1632_v13 = vld [vmem:[%s1916_s28 + $0x90] ss:$12 sps:$4 sm:$0xff]   ;;  %v1637_v15 = vld [vmem:[%s1916_s28 + $0xa8] ss:$12 sps:$4 sm:$0xff]  }
  0x47   : > { %1496 = vmatpush3.bf16.msra.mxu1 %v1590_v41 }
  0x48   : > { %1497 = vmatprep.subr.bf16.mxu1 %v1593_v44 }
  0x49   : > { %1418 = vmatpush3.bf16.msra.mxu0 %v1592_v43 }
  0x4a   : > { %1419 = vmatprep.subr.bf16.mxu0 %v1594_v45 }
  0x4b   : > { %1498 = vmatpush3.bf16.msra.mxu1 %v1593_v44 }
  0x4c   : > { %1499 = vmatprep.subr.bf16.mxu1 %v1596_v46 }
  0x4d   : > { %1420 = vmatpush3.bf16.msra.mxu0 %v1595_v47 }
  0x4e   : > { %1421 = vmatprep.subr.bf16.mxu0 %v1597_v48 }
  0x4f   : > { %1500 = vmatpush3.bf16.msra.mxu1 %v1596_v46 }
  0x50   : > { %1501 = vmatprep.subr.bf16.mxu1 %v1599_v49 }
  0x51   : > { %1422 = vmatpush3.bf16.msra.mxu0 %v1598_v50 }
  0x52   : > { %1423 = vmatprep.subr.bf16.mxu0 %v1600_v51 }
  0x53   : > { %1502 = vmatpush3.bf16.msra.mxu1 %v1599_v49 }
  0x54   : > { %1503 = vmatprep.subr.bf16.mxu1 %v1602_v53 }
  0x55   : > { %1424 = vmatpush3.bf16.msra.mxu0 %v1601_v52 }
  0x56   : > { %1425 = vmatprep.subr.bf16.mxu0 %v1603_v54 }
  0x57   : > { %1504 = vmatpush3.bf16.msra.mxu1 %v1602_v53 }
  0x58   : > { %1505 = vmatprep.subr.bf16.mxu1 %v1605_v56 }
  0x59   : > { %1426 = vmatpush3.bf16.msra.mxu0 %v1604_v57 }
  0x5b   : > { %1506 = vmatpush3.bf16.msra.mxu1 %v1605_v56 }
  0x5c   : > { %712 = vmatmul.mubr.bf16.vlgmr.msra.gmra.mrb[0].mxu0 %v1606_v58 }
  0x5d   : > { %719 = vmatprep.mubr.bf16.mxu0 %v1611_v59 }
  0x5e   : > { %1508 = vmatmul.mubr.bf16.vlgmr.msra.gmra.mrb[0].mxu1 %v1610_v60 }
  0x5f   : > { %1511 = vmatprep.mubr.bf16.mxu1 %v1617_v61 }
  0x64   : > { %720 = vmatmul.mubr.bf16.gmra.mrb[4].mxu0 %v1613_v62 }
  0x65   : > { %727 = vmatprep.mubr.bf16.mxu0 %v1614_v63 }
  0x66   : > { %1512 = vmatmul.mubr.bf16.gmra.mrb[4].mxu1 %v1618_v0 }
  0x67   : > { %1515 = vmatprep.mubr.bf16.mxu1 %v1625_v1 }
  0x6c   : > { %728 = vmatmul.mubr.bf16.gmra.mrb[8].mxu0 %v1616_v2 }
  0x6d   : > { %735 = vmatprep.mubr.bf16.mxu0 %v1619_v3 }
  0x6e   : > { %1516 = vmatmul.mubr.bf16.gmra.mrb[8].mxu1 %v1626_v4 }
  0x6f   : > { %1519 = vmatprep.mubr.bf16.mxu1 %v1633_v5 }
  0x74   : > { %736 = vmatmul.mubr.bf16.gmra.mrb[12].mxu0 %v1621_v6 }
  0x75   : > { %743 = vmatprep.mubr.bf16.mxu0 %v1622_v7 }
  0x76   : > { %1520 = vmatmul.mubr.bf16.gmra.mrb[12].mxu1 %v1634_v8 }
  0x7c   : > { %744 = vmatmul.mubr.bf16.gmra.mrb[16].mxu0 %v1624_v9 }
  0x7d   : > { %751 = vmatprep.mubr.bf16.mxu0 %v1627_v10 }
  0x84   : > { %752 = vmatmul.mubr.bf16.gmra.mrb[20].mxu0 %v1629_v11 }
  0x85   : > { %759 = vmatprep.mubr.bf16.mxu0 %v1630_v12 }
  0x8c   : > { %760 = vmatmul.mubr.bf16.gmra.mrb[24].mxu0 %v1632_v13 }
  0x8d   : > { %767 = vmatprep.mubr.bf16.mxu0 %v1635_v14 }
  0x94   : > { %768 = vmatmul.mubr.bf16.gmra.mrb[28].mxu0 %v1637_v15 }
 0x12f   : > { %v1427_v16 = vpop.f32.mrb[0].mxu0 }
 0x130   : > { %v1428_v17 = vpop.f32.mrb[1].mxu0 }
 0x131   : > { %v1429_v18 = vadd.f32 %v1428_v17, %v1427_v16  ;;  %v1430_v19 = vpop.f32.mrb[2].mxu0  ;;  %v1509_v20 = vpop.f32.mrb[0].mxu1 }
 0x132   : > { %v1431_v21 = vpop.f32.mrb[3].mxu0  ;;  %v810_v22 = vpop.f32.mrb[1].mxu1 }
 0x133   : > { %v1432_v23 = vadd.f32 %v1431_v21, %v1430_v19  ;;  %v1976_v24 = vadd.f32 %v1429_v18, %v810_v22  ;;  %v1510_v25 = vpop.f32.mrb[2].mxu1 }
 0x134   : > { %v813_v26 = vpop.f32.mrb[3].mxu1 }
 0x135   : > { %v1978_v27 = vadd.f32 %v1432_v23, %v813_v26 }
 0x137   : > { %v1433_v28 = vpop.f32.mrb[4].mxu0 }
 0x138   : > { %v1434_v29 = vpop.f32.mrb[5].mxu0 }
 0x139   : > { %v1435_v30 = vadd.f32 %v1434_v29, %v1433_v28  ;;  %v1436_v31 = vpop.f32.mrb[6].mxu0  ;;  %v1513_v32 = vpop.f32.mrb[4].mxu1 }
 0x13a   : > { %v1437_v33 = vpop.f32.mrb[7].mxu0  ;;  %v826_v34 = vpop.f32.mrb[5].mxu1 }
 0x13b   : > { %v1980_v35 = vadd.f32 %v1509_v20, %v1435_v30  ;;  %v1438_v36 = vadd.f32 %v1437_v33, %v1436_v31  ;;  %v1514_v37 = vpop.f32.mrb[6].mxu1 }
 0x13c   : > { %v829_v38 = vpop.f32.mrb[7].mxu1 }
 0x13d   : > { %v1982_v39 = vadd.f32 %v1510_v25, %v1438_v36  ;;  %v878_v36 = vld [vmem:[%s1914_s27 + $0x8] sm:$0xff] (!%p1406_p12) }
 0x13f   : > { %v1439_v40 = vpop.f32.mrb[8].mxu0 }
 0x140   : > { %v1440_v41 = vpop.f32.mrb[9].mxu0 }
 0x141   : > { %v1441_v42 = vadd.f32 %v1440_v41, %v1439_v40  ;;  %v1442_v43 = vpop.f32.mrb[10].mxu0  ;;  %v1517_v44 = vpop.f32.mrb[8].mxu1  ;;  %v894_v40 = vadd.f32 (!%p1406_p12), %v878_v36, %v1978_v27 }
 0x142   : > { %v1443_v45 = vpop.f32.mrb[11].mxu0  ;;  %v842_v46 = vpop.f32.mrb[9].mxu1 }
 0x143   : > { %v1444_v47 = vadd.f32 %v1443_v45, %v1442_v43  ;;  %v1984_v48 = vadd.f32 %v1441_v42, %v826_v34  ;;  %v1518_v49 = vpop.f32.mrb[10].mxu1  ;;  %v877_v34 = vld [vmem:[%s1914_s27] sm:$0xff] (!%p1406_p12)  ;;  %v880_v42 = vld [vmem:[%s1914_s27 + $0x18] sm:$0xff] (!%p1406_p12)  ;;  %910 = vst [vmem:[#allocation2 + $0x8] sm:$0xff] (!%p1406_p12), %v894_v40 }
 0x144   : > { %v845_v50 = vpop.f32.mrb[11].mxu1  ;;  %v881_v43 = vld [vmem:[%s1914_s27 + $0x20] sm:$0xff] (!%p1406_p12)  ;;  %v896_v45 = vadd.f32 (!%p1406_p12), %v880_v42, %v1982_v39 }
 0x145   : > { %v1986_v51 = vadd.f32 %v1444_v47, %v829_v38  ;;  %v893_v38 = vadd.f32 (!%p1406_p12), %v877_v34, %v1976_v24 }
 0x146   : > { %912 = vst [vmem:[#allocation2 + $0x18] sm:$0xff] (!%p1406_p12), %v896_v45 }
 0x147   : > { %v1445_v52 = vpop.f32.mrb[12].mxu0  ;;  %909 = vst [vmem:[#allocation2] sm:$0xff] (!%p1406_p12), %v893_v38 }
 0x148   : > { %v1446_v53 = vpop.f32.mrb[13].mxu0 }
 0x149   : > { %v1447_v54 = vadd.f32 %v1446_v53, %v1445_v52  ;;  %v1448_v55 = vpop.f32.mrb[14].mxu0  ;;  %v1521_v56 = vpop.f32.mrb[12].mxu1  ;;  %v885_v52 = vld [vmem:[%s1914_s27 + $0x40] sm:$0xff] (!%p1406_p12) }
 0x14a   : > { %v1449_v57 = vpop.f32.mrb[15].mxu0  ;;  %v858_v58 = vpop.f32.mrb[13].mxu1 }
 0x14b   : > { %v1988_v59 = vadd.f32 %v1513_v32, %v1447_v54  ;;  %v1450_v60 = vadd.f32 %v1449_v57, %v1448_v55  ;;  %v1522_v61 = vpop.f32.mrb[14].mxu1  ;;  %v887_v57 = vld [vmem:[%s1914_s27 + $0x50] sm:$0xff] (!%p1406_p12) }
 0x14c   : > { %v861_v62 = vpop.f32.mrb[15].mxu1 }
 0x14d   : > { %v1990_v63 = vadd.f32 %v1514_v37, %v1450_v60  ;;  %v879_v37 = vld [vmem:[%s1914_s27 + $0x10] sm:$0xff] (!%p1406_p12) }
 0x14e   : > { %v895_v41 = vadd.f32 (!%p1406_p12), %v879_v37, %v1980_v35 }
 0x14f   : > { %v1451_v0 = vpop.f32.mrb[16].mxu0 }
 0x150   : > { %v1452_v1 = vpop.f32.mrb[17].mxu0  ;;  %911 = vst [vmem:[#allocation2 + $0x10] sm:$0xff] (!%p1406_p12), %v895_v41 }
 0x151   : > { %v1453_v2 = vadd.f32 %v1452_v1, %v1451_v0  ;;  %v1454_v3 = vpop.f32.mrb[18].mxu0  ;;  %v889_v0 = vld [vmem:[%s1914_s27 + $0x60] sm:$0xff] (!%p1406_p12)  ;;  %v890_v1 = vld [vmem:[%s1914_s27 + $0x68] sm:$0xff] (!%p1406_p12) }
 0x152   : > { %v1455_v4 = vpop.f32.mrb[19].mxu0 }
 0x153   : > { %v1456_v5 = vadd.f32 %v1455_v4, %v1454_v3  ;;  %v1992_v6 = vadd.f32 %v1453_v2, %v842_v46  ;;  %v897_v46 = vadd.f32 (!%p1406_p12), %v881_v43, %v1984_v48  ;;  %v891_v2 = vld [vmem:[%s1914_s27 + $0x70] sm:$0xff] (!%p1406_p12) }
 0x155   : > { %v1994_v7 = vadd.f32 %v1456_v5, %v845_v50  ;;  %v884_v50 = vld [vmem:[%s1914_s27 + $0x38] sm:$0xff] (!%p1406_p12)  ;;  %v901_v55 = vadd.f32 (!%p1406_p12), %v885_v52, %v1992_v6  ;;  %913 = vst [vmem:[#allocation2 + $0x20] sm:$0xff] (!%p1406_p12), %v897_v46 }
 0x156   : > { %v900_v54 = vadd.f32 (!%p1406_p12), %v884_v50, %v1990_v63 }
 0x157   : > { %v1457_v8 = vpop.f32.mrb[20].mxu0  ;;  %917 = vst [vmem:[#allocation2 + $0x40] sm:$0xff] (!%p1406_p12), %v901_v55 }
 0x158   : > { %v1458_v9 = vpop.f32.mrb[21].mxu0  ;;  %916 = vst [vmem:[#allocation2 + $0x38] sm:$0xff] (!%p1406_p12), %v900_v54 }
 0x159   : > { %v1459_v10 = vadd.f32 %v1458_v9, %v1457_v8  ;;  %v1460_v11 = vpop.f32.mrb[22].mxu0  ;;  %v892_v8 = vld [vmem:[%s1914_s27 + $0x78] sm:$0xff] (!%p1406_p12) }
 0x15a   : > { %v1461_v12 = vpop.f32.mrb[23].mxu0 }
 0x15b   : > { %v1996_v13 = vadd.f32 %v1517_v44, %v1459_v10  ;;  %v1462_v14 = vadd.f32 %v1461_v12, %v1460_v11  ;;  %v882_v44 = vld [vmem:[%s1914_s27 + $0x28] sm:$0xff] (!%p1406_p12) }
 0x15c   : > { %v898_v47 = vadd.f32 (!%p1406_p12), %v882_v44, %v1986_v51 }
 0x15d   : > { %v1998_v15 = vadd.f32 %v1518_v49, %v1462_v14  ;;  %v883_v49 = vld [vmem:[%s1914_s27 + $0x30] sm:$0xff] (!%p1406_p12) }
 0x15e   : > { %v899_v53 = vadd.f32 (!%p1406_p12), %v883_v49, %v1988_v59  ;;  %914 = vst [vmem:[#allocation2 + $0x28] sm:$0xff] (!%p1406_p12), %v898_v47 }
 0x15f   : > { %v1463_v16 = vpop.f32.mrb[24].mxu0 }
 0x160   : > { %v1464_v17 = vpop.f32.mrb[25].mxu0  ;;  %915 = vst [vmem:[#allocation2 + $0x30] sm:$0xff] (!%p1406_p12), %v899_v53 }
 0x161   : > { %v1465_v18 = vadd.f32 %v1464_v17, %v1463_v16  ;;  %v1466_v19 = vpop.f32.mrb[26].mxu0 }
 0x162   : > { %v1467_v20 = vpop.f32.mrb[27].mxu0 }
 0x163   : > { %v1468_v21 = vadd.f32 %v1467_v20, %v1466_v19  ;;  %v2000_v22 = vadd.f32 %v1465_v18, %v858_v58  ;;  %v888_v58 = vld [vmem:[%s1914_s27 + $0x58] sm:$0xff] (!%p1406_p12) }
 0x165   : > { %v2002_v23 = vadd.f32 %v1468_v21, %v861_v62  ;;  %v904_v62 = vadd.f32 (!%p1406_p12), %v888_v58, %v1998_v15  ;;  %v905_v3 = vadd.f32 (!%p1406_p12), %v889_v0, %v2000_v22 }
 0x167   : > { %v1469_v25 = vpop.f32.mrb[28].mxu0  ;;  %876 = sbr.rel (%p1406_p12) target bundleno = 370 (0x172), region = 62  ;;  %v906_v4 = vadd.f32 (!%p1406_p12), %v890_v1, %v2002_v23  ;;  %920 = vst [vmem:[#allocation2 + $0x58] sm:$0xff] (!%p1406_p12), %v904_v62  ;;  %921 = vst [vmem:[#allocation2 + $0x60] sm:$0xff] (!%p1406_p12), %v905_v3 }
 0x168   : > { %v1470_v26 = vpop.f32.mrb[29].mxu0 }
 0x169   : > { %v1471_v28 = vadd.f32 %v1470_v26, %v1469_v25  ;;  %v1472_v29 = vpop.f32.mrb[30].mxu0  ;;  %922 = vst [vmem:[#allocation2 + $0x68] sm:$0xff] (!%p1406_p12), %v906_v4 }
 0x16a   : > { %v1473_v30 = vpop.f32.mrb[31].mxu0 }
 0x16b   : > { %v2004_v31 = vadd.f32 %v1521_v56, %v1471_v28  ;;  %v1474_v32 = vadd.f32 %v1473_v30, %v1472_v29  ;;  %v886_v56 = vld [vmem:[%s1914_s27 + $0x48] sm:$0xff] (!%p1406_p12) }
 0x16c   : > { %v902_v60 = vadd.f32 (!%p1406_p12), %v886_v56, %v1994_v7 }
 0x16d   : > { %v2006_v33 = vadd.f32 %v1522_v61, %v1474_v32  ;;  %v903_v61 = vadd.f32 (!%p1406_p12), %v887_v57, %v1996_v13  ;;  %v907_v5 = vadd.f32 (!%p1406_p12), %v891_v2, %v2004_v31 }
 0x16e   : > { %918 = vst [vmem:[#allocation2 + $0x48] sm:$0xff] %v902_v60 }
 0x16f   : > { %919 = vst [vmem:[#allocation2 + $0x50] sm:$0xff] %v903_v61  ;;  %v908_v9 = vadd.f32 %v892_v8, %v2006_v33  ;;  %923 = vst [vmem:[#allocation2 + $0x70] sm:$0xff] %v907_v5 }
 0x171   : > { %924 = vst [vmem:[#allocation2 + $0x78] sm:$0xff] %v908_v9 }
 0x172 PF: > { %p1407_p13 = scmp.le.s32.totalorder %s1740_s14, 0 }
 0x173   : > { %v929_v10 = vld [vmem:[#allocation2] sm:$0xff] (!%p1407_p13)  ;;  %v930_v11 = vld [vmem:[#allocation2 + $0x8] sm:$0xff] (!%p1407_p13)  ;;  %v931_v12 = vld [vmem:[#allocation2 + $0x10] sm:$0xff] (!%p1407_p13) }
 0x174   : > { %928 = sbr.rel (%p1407_p13) target bundleno = 382 (0x17e), region = 66  ;;  %v945_v14 = vadd.f32 (!%p1407_p13), %v929_v10, %v1976_v24  ;;  %v946_v16 = vadd.f32 (!%p1407_p13), %v930_v11, %v1978_v27  ;;  %v947_v17 = vadd.f32 (!%p1407_p13), %v931_v12, %v1980_v35  ;;  %v932_v18 = vld [vmem:[#allocation2 + $0x18] sm:$0xff] (!%p1407_p13)  ;;  %v933_v19 = vld [vmem:[#allocation2 + $0x20] sm:$0xff] (!%p1407_p13)  ;;  %v934_v20 = vld [vmem:[#allocation2 + $0x28] sm:$0xff] (!%p1407_p13) }
 0x175   : > { %v948_v21 = vadd.f32 (!%p1407_p13), %v932_v18, %v1982_v39  ;;  %v949_v25 = vadd.f32 (!%p1407_p13), %v933_v19, %v1984_v48  ;;  %v950_v26 = vadd.f32 (!%p1407_p13), %v934_v20, %v1986_v51  ;;  %v935_v28 = vld [vmem:[#allocation2 + $0x30] sm:$0xff] (!%p1407_p13)  ;;  %v936_v29 = vld [vmem:[#allocation2 + $0x38] sm:$0xff] (!%p1407_p13)  ;;  %v937_v30 = vld [vmem:[#allocation2 + $0x40] sm:$0xff] (!%p1407_p13) }
 0x176   : > { %961 = vst [vmem:[#allocation2] sm:$0xff] (!%p1407_p13), %v945_v14  ;;  %962 = vst [vmem:[#allocation2 + $0x8] sm:$0xff] (!%p1407_p13), %v946_v16  ;;  %v951_v24 = vadd.f32 (!%p1407_p13), %v935_v28, %v1988_v59  ;;  %v952_v27 = vadd.f32 (!%p1407_p13), %v936_v29, %v1990_v63  ;;  %v953_v35 = vadd.f32 (!%p1407_p13), %v937_v30, %v1992_v6  ;;  %v939_v34 = vld [vmem:[#allocation2 + $0x50] sm:$0xff] (!%p1407_p13)  ;;  %v940_v36 = vld [vmem:[#allocation2 + $0x58] sm:$0xff] (!%p1407_p13) }
 0x177   : > { %963 = vst [vmem:[#allocation2 + $0x10] sm:$0xff] (!%p1407_p13), %v947_v17  ;;  %964 = vst [vmem:[#allocation2 + $0x18] sm:$0xff] (!%p1407_p13), %v948_v21  ;;  %v955_v48 = vadd.f32 (!%p1407_p13), %v939_v34, %v1996_v13  ;;  %v956_v51 = vadd.f32 (!%p1407_p13), %v940_v36, %v1998_v15  ;;  %v941_v37 = vld [vmem:[#allocation2 + $0x60] sm:$0xff] (!%p1407_p13)  ;;  %v942_v38 = vld [vmem:[#allocation2 + $0x68] sm:$0xff] (!%p1407_p13) }
 0x178   : > { %965 = vst [vmem:[#allocation2 + $0x20] sm:$0xff] (!%p1407_p13), %v949_v25  ;;  %966 = vst [vmem:[#allocation2 + $0x28] sm:$0xff] (!%p1407_p13), %v950_v26  ;;  %v943_v40 = vld [vmem:[#allocation2 + $0x70] sm:$0xff] (!%p1407_p13)  ;;  %v957_v59 = vadd.f32 (!%p1407_p13), %v941_v37, %v2000_v22  ;;  %v958_v63 = vadd.f32 (!%p1407_p13), %v942_v38, %v2002_v23  ;;  %v944_v41 = vld [vmem:[#allocation2 + $0x78] sm:$0xff] (!%p1407_p13) }
 0x179   : > { %v938_v32 = vld [vmem:[#allocation2 + $0x48] sm:$0xff] (!%p1407_p13)  ;;  %967 = vst [vmem:[#allocation2 + $0x30] sm:$0xff] (!%p1407_p13), %v951_v24  ;;  %968 = vst [vmem:[#allocation2 + $0x38] sm:$0xff] (!%p1407_p13), %v952_v27  ;;  %v959_v6 = vadd.f32 (!%p1407_p13), %v943_v40, %v2004_v31 }
 0x17a   : > { %v954_v39 = vadd.f32 (!%p1407_p13), %v938_v32, %v1994_v7  ;;  %969 = vst [vmem:[#allocation2 + $0x40] sm:$0xff] (!%p1407_p13), %v953_v35  ;;  %971 = vst [vmem:[#allocation2 + $0x50] sm:$0xff] (!%p1407_p13), %v955_v48  ;;  %v960_v7 = vadd.f32 (!%p1407_p13), %v944_v41, %v2006_v33 }
 0x17b   : > { %972 = vst [vmem:[#allocation2 + $0x58] sm:$0xff] %v956_v51  ;;  %973 = vst [vmem:[#allocation2 + $0x60] sm:$0xff] %v957_v59 }
 0x17c   : > { %970 = vst [vmem:[#allocation2 + $0x48] sm:$0xff] %v954_v39  ;;  %974 = vst [vmem:[#allocation2 + $0x68] sm:$0xff] %v958_v63 }
 0x17d   : > { %975 = vst [vmem:[#allocation2 + $0x70] sm:$0xff] %v959_v6  ;;  %976 = vst [vmem:[#allocation2 + $0x78] sm:$0xff] %v960_v7 }
 0x17e PF: > { %p1408_p0 = scmp.ne.s32.totalorder %s1740_s14, 1 }
 0x17f   : > { %v1013_v15 = vlaneseq (!%p1408_p0) }
 0x180   : > { %980 = sbr.rel (%p1408_p0) target bundleno = 736 (0x2e0), region = 70  ;;  %v981_v13 = vld [vmem:[#allocation2] sm:$0xff] (!%p1408_p0)  ;;  %v982_v23 = vld [vmem:[#allocation2 + $0x8] sm:$0xff] (!%p1408_p0) }
 0x181   : > { %v983_v22 = vld [vmem:[#allocation2 + $0x10] sm:$0xff] (!%p1408_p0)  ;;  %v997_v42 = vmax.f32 (!%p1408_p0), %v981_v13, 0.0  ;;  %v984_v43 = vld [vmem:[#allocation2 + $0x18] sm:$0xff] (!%p1408_p0)  ;;  %v1014_v44 = vand.u32 (!%p1408_p0), 127, %v1013_v15  ;;  %v998_v45 = vmax.f32 (!%p1408_p0), %v982_v23, 0.0 }
 0x182   : > { %v999_v31 = vmax.f32 (!%p1408_p0), %v983_v22, 0.0  ;;  %v1000_v46 = vmax.f32 (!%p1408_p0), %v984_v43, 0.0  ;;  %v985_v33 = vld [vmem:[#allocation2 + $0x20] sm:$0xff] (!%p1408_p0)  ;;  %v986_v47 = vld [vmem:[#allocation2 + $0x28] sm:$0xff] (!%p1408_p0) }
 0x183   : > { %vm1015_vm0 = vcmp.lt.s32.totalorder (!%p1408_p0), %v1014_v44, 4  ;;  %v1001_v54 = vmax.f32 (!%p1408_p0), %v985_v33, 0.0  ;;  %v1002_v55 = vmax.f32 (!%p1408_p0), %v986_v47, 0.0  ;;  %v987_v56 = vld [vmem:[#allocation2 + $0x30] sm:$0xff] (!%p1408_p0)  ;;  %v988_v57 = vld [vmem:[#allocation2 + $0x38] sm:$0xff] (!%p1408_p0)  ;;  %v990_v1 = vld [vmem:[#allocation2 + $0x48] sm:$0xff] (!%p1408_p0) }
 0x184   : > { %v1016_v49 = vsel (!%p1408_p0), %vm1015_vm0, %v997_v42, -1e+30  ;;  %v1018_v50 = vsel (!%p1408_p0), %vm1015_vm0, %v999_v31, -1e+30  ;;  %v1017_v52 = vsel (!%p1408_p0), %vm1015_vm0, %v998_v45, -1e+30 }
 0x185   : > { %1032 = vmax.xlane.f32.xlu0 (!%p1408_p0), %v1016_v49  ;;  %1036 = vmax.xlane.f32.xlu1 (!%p1408_p0), %v1018_v50  ;;  %v1019_v53 = vsel (!%p1408_p0), %vm1015_vm0, %v1000_v46, -1e+30  ;;  %v1020_v58 = vsel (!%p1408_p0), %vm1015_vm0, %v1001_v54, -1e+30  ;;  %v1021_v60 = vsel (!%p1408_p0), %vm1015_vm0, %v1002_v55, -1e+30 }
 0x186   : > { %v1003_v61 = vmax.f32 (!%p1408_p0), %v987_v56, 0.0  ;;  %v1004_v62 = vmax.f32 (!%p1408_p0), %v988_v57, 0.0  ;;  %v989_v0 = vld [vmem:[#allocation2 + $0x40] sm:$0xff] (!%p1408_p0)  ;;  %v1006_v5 = vmax.f32 (!%p1408_p0), %v990_v1, 0.0  ;;  %v991_v8 = vld [vmem:[#allocation2 + $0x50] sm:$0xff] (!%p1408_p0)  ;;  %v992_v9 = vld [vmem:[#allocation2 + $0x58] sm:$0xff] (!%p1408_p0) }
 0x187   : > { %v1005_v4 = vmax.f32 %v989_v0, 0.0  ;;  %v1007_v12 = vmax.f32 %v991_v8, 0.0  ;;  %v1008_v14 = vmax.f32 %v992_v9, 0.0  ;;  %v993_v16 = vld [vmem:[#allocation2 + $0x60] sm:$0xff]  ;;  %v994_v17 = vld [vmem:[#allocation2 + $0x68] sm:$0xff]  ;;  %v995_v25 = vld [vmem:[#allocation2 + $0x70] sm:$0xff] }
 0x188   : > { %v1022_v2 = vsel %vm1015_vm0, %v1003_v61, -1e+30  ;;  %v1023_v3 = vsel %vm1015_vm0, %v1004_v62, -1e+30  ;;  %v1025_v11 = vsel %vm1015_vm0, %v1006_v5, -1e+30 }
 0x189   : > { %1034 = vmax.xlane.f32.xlu0 %v1017_v52  ;;  %1038 = vmax.xlane.f32.xlu1 %v1019_v53  ;;  %v1024_v10 = vsel %vm1015_vm0, %v1005_v4, -1e+30  ;;  %v2070_v18 = vsel %vm1015_vm0, %v1007_v12, -1e+30  ;;  %v2073_v19 = vsel %vm1015_vm0, %v1008_v14, -1e+30 }
 0x18a   : > { %v1009_v20 = vmax.f32 %v993_v16, 0.0  ;;  %v1010_v21 = vmax.f32 %v994_v17, 0.0  ;;  %v996_v26 = vld [vmem:[#allocation2 + $0x78] sm:$0xff]  ;;  %v1011_v30 = vmax.f32 %v995_v25, 0.0 }
 0x18b   : > { %v1012_v24 = vmax.f32 %v996_v26, 0.0 }
 0x18c   : > { %v2078_v28 = vsel %vm1015_vm0, %v1009_v20, -1e+30  ;;  %v2081_v29 = vsel %vm1015_vm0, %v1010_v21, -1e+30  ;;  %v2086_v27 = vsel %vm1015_vm0, %v1011_v30, -1e+30 }
 0x18d   : > { %1040 = vmax.xlane.f32.xlu0 %v1020_v58  ;;  %1042 = vmax.xlane.f32.xlu1 %v1021_v60  ;;  %v2089_v35 = vsel %vm1015_vm0, %v1012_v24, -1e+30 }
 0x191   : > { %1044 = vmax.xlane.f32.xlu0 %v1022_v2  ;;  %1046 = vmax.xlane.f32.xlu1 %v1023_v3 }
 0x195   : > { %1048 = vmax.xlane.f32.xlu0 %v1024_v10  ;;  %1050 = vmax.xlane.f32.xlu1 %v1025_v11 }
 0x199   : > { %1052 = vmax.xlane.f32.xlu0 %v2070_v18  ;;  %1054 = vmax.xlane.f32.xlu1 %v2073_v19 }
 0x19d   : > { %1056 = vmax.xlane.f32.xlu0 %v2078_v28  ;;  %1058 = vmax.xlane.f32.xlu1 %v2081_v29 }
 0x1a1   : > { %1060 = vmax.xlane.f32.xlu0 %v2086_v27  ;;  %1062 = vmax.xlane.f32.xlu1 %v2089_v35 }
 0x212   : > { %v1033_v32 = vpop.xlane.xlu0 %1032  ;;  %v1037_v34 = vpop.xlane.xlu1 %1036 }
 0x213   : > { %v2093_v36 = vsub.f32 %v1016_v49, %v1033_v32  ;;  %v2095_v39 = vsub.f32 %v1018_v50, %v1037_v34 }
 0x215   : > { %v1080_v48 = vmul.f32 1.442695, %v2093_v36  ;;  %v1084_v51 = vmul.f32 1.442695, %v2095_v39 }
 0x216   : > { %v1035_v37 = vpop.xlane.xlu0 %1034  ;;  %v1039_v38 = vpop.xlane.xlu1 %1038 }
 0x217   : > { %1638 = vpow2.f32 %v1080_v48  ;;  %v2099_v40 = vsub.f32 %v1017_v52, %v1035_v37  ;;  %v2101_v59 = vsub.f32 %v1019_v53, %v1039_v38 }
 0x218   : > { %1640 = vpow2.f32 %v1084_v51 }
 0x219   : > { %v1082_v63 = vmul.f32 1.442695, %v2099_v40  ;;  %v1086_v6 = vmul.f32 1.442695, %v2101_v59 }
 0x21a   : > { %v1041_v41 = vpop.xlane.xlu0 %1040  ;;  %v1043_v7 = vpop.xlane.xlu1 %1042 }
 0x21b   : > { %1642 = vpow2.f32 %v1082_v63  ;;  %v2105_v13 = vsub.f32 %v1020_v58, %v1041_v41  ;;  %v2107_v15 = vsub.f32 %v1021_v60, %v1043_v7 }
 0x21c   : > { %1644 = vpow2.f32 %v1086_v6 }
 0x21d   : > { %v1088_v22 = vmul.f32 1.442695, %v2105_v13  ;;  %v1090_v23 = vmul.f32 1.442695, %v2107_v15 }
 0x21e   : > { %v1045_v42 = vpop.xlane.xlu0 %1044  ;;  %v1047_v31 = vpop.xlane.xlu1 %1046 }
 0x21f   : > { %1646 = vpow2.f32 %v1088_v22  ;;  %v2111_v43 = vsub.f32 %v1022_v2, %v1045_v42  ;;  %v2113_v44 = vsub.f32 %v1023_v3, %v1047_v31 }
 0x220   : > { %1648 = vpow2.f32 %v1090_v23 }
 0x221   : > { %v1639_v45 = vpop.eup %1638  ;;  %v1092_v46 = vmul.f32 1.442695, %v2111_v43  ;;  %v1094_v33 = vmul.f32 1.442695, %v2113_v44 }
 0x222   : > { %1112 = vadd.xlane.f32.xlu0 %v1639_v45  ;;  %v1049_v47 = vpop.xlane.xlu0 %1048  ;;  %v1051_v49 = vpop.xlane.xlu1 %1050 }
 0x223   : > { %v1641_v50 = vpop.eup %1640  ;;  %1650 = vpow2.f32 %v1092_v46  ;;  %v2117_v52 = vsub.f32 %v1024_v10, %v1049_v47  ;;  %v2119_v53 = vsub.f32 %v1025_v11, %v1051_v49 }
 0x224   : > { %1652 = vpow2.f32 %v1094_v33 }
 0x225   : > { %v1643_v54 = vpop.eup %1642  ;;  %v1096_v55 = vmul.f32 1.442695, %v2117_v52  ;;  %v1098_v56 = vmul.f32 1.442695, %v2119_v53 }
 0x226   : > { %1116 = vadd.xlane.f32.xlu0 %v1641_v50  ;;  %1114 = vadd.xlane.f32.xlu1 %v1643_v54  ;;  %v1053_v57 = vpop.xlane.xlu0 %1052  ;;  %v1055_v58 = vpop.xlane.xlu1 %1054 }
 0x227   : > { %v1645_v60 = vpop.eup %1644  ;;  %1654 = vpow2.f32 %v1096_v55  ;;  %v2124_v61 = vsub.f32 %v2070_v18, %v1053_v57  ;;  %v2127_v62 = vsub.f32 %v2073_v19, %v1055_v58 }
 0x228   : > { %1656 = vpow2.f32 %v1098_v56 }
 0x229   : > { %v1647_v0 = vpop.eup %1646  ;;  %v1100_v1 = vmul.f32 1.442695, %v2124_v61  ;;  %v1102_v2 = vmul.f32 1.442695, %v2127_v62 }
 0x22a   : > { %1118 = vadd.xlane.f32.xlu1 %v1645_v60  ;;  %1120 = vadd.xlane.f32.xlu0 %v1647_v0  ;;  %v1057_v3 = vpop.xlane.xlu0 %1056  ;;  %v1059_v4 = vpop.xlane.xlu1 %1058 }
 0x22b   : > { %v1649_v5 = vpop.eup %1648  ;;  %1658 = vpow2.f32 %v1100_v1  ;;  %v2132_v8 = vsub.f32 %v2078_v28, %v1057_v3  ;;  %v2135_v9 = vsub.f32 %v2081_v29, %v1059_v4 }
 0x22c   : > { %1660 = vpow2.f32 %v1102_v2 }
 0x22d   : > { %v1651_v10 = vpop.eup %1650  ;;  %v1104_v11 = vmul.f32 1.442695, %v2132_v8  ;;  %v1106_v12 = vmul.f32 1.442695, %v2135_v9 }
 0x22e   : > { %1122 = vadd.xlane.f32.xlu1 %v1649_v5  ;;  %1124 = vadd.xlane.f32.xlu0 %v1651_v10  ;;  %v1061_v14 = vpop.xlane.xlu0 %1060  ;;  %v1063_v16 = vpop.xlane.xlu1 %1062 }
 0x22f   : > { %v1653_v17 = vpop.eup %1652  ;;  %1662 = vpow2.f32 %v1104_v11  ;;  %v2140_v18 = vsub.f32 %v2086_v27, %v1061_v14  ;;  %v2143_v19 = vsub.f32 %v2089_v35, %v1063_v16 }
 0x230   : > { %1664 = vpow2.f32 %v1106_v12 }
 0x231   : > { %v1655_v20 = vpop.eup %1654  ;;  %v1108_v21 = vmul.f32 1.442695, %v2140_v18  ;;  %v1110_v25 = vmul.f32 1.442695, %v2143_v19 }
 0x232   : > { %1126 = vadd.xlane.f32.xlu1 %v1653_v17  ;;  %1128 = vadd.xlane.f32.xlu0 %v1655_v20  ;;  %v1657_v26 = vpop.eup %1656 }
 0x233   : > { %1666 = vpow2.f32 %v1108_v21 }
 0x234   : > { %1668 = vpow2.f32 %v1110_v25 }
 0x235   : > { %v1659_v28 = vpop.eup %1658 }
 0x236   : > { %1130 = vadd.xlane.f32.xlu1 %v1657_v26  ;;  %1132 = vadd.xlane.f32.xlu0 %v1659_v28  ;;  %v1661_v29 = vpop.eup %1660 }
 0x239   : > { %v1663_v30 = vpop.eup %1662 }
 0x23a   : > { %1134 = vadd.xlane.f32.xlu1 %v1661_v29  ;;  %1136 = vadd.xlane.f32.xlu0 %v1663_v30  ;;  %v1665_v24 = vpop.eup %1664 }
 0x23d   : > { %v1667_v27 = vpop.eup %1666 }
 0x23e   : > { %1138 = vadd.xlane.f32.xlu1 %v1665_v24  ;;  %1140 = vadd.xlane.f32.xlu0 %v1667_v27  ;;  %v1669_v35 = vpop.eup %1668 }
 0x242   : > { %1142 = vadd.xlane.f32.xlu1 %v1669_v35 }
 0x2af   : > { %v1113_v32 = vpop.xlane.xlu0 %1112 }
 0x2b0   : > { %1670 = vlog2.f32 %v1113_v32 }
 0x2b3   : > { %v1115_v34 = vpop.xlane.xlu1 %1114  ;;  %v1117_v48 = vpop.xlane.xlu0 %1116 }
 0x2b4   : > { %1672 = vlog2.f32 %v1115_v34 }
 0x2b5   : > { %1674 = vlog2.f32 %v1117_v48 }
 0x2b7   : > { %v1119_v51 = vpop.xlane.xlu1 %1118  ;;  %v1121_v37 = vpop.xlane.xlu0 %1120 }
 0x2b8   : > { %1676 = vlog2.f32 %v1119_v51 }
 0x2b9   : > { %1678 = vlog2.f32 %v1121_v37 }
 0x2ba   : > { %v1671_v38 = vpop.eup %1670 }
 0x2bb   : > { %v1145_v63 = vmul.f32 0.6931472, %v1671_v38  ;;  %v1123_v6 = vpop.xlane.xlu1 %1122  ;;  %v1125_v41 = vpop.xlane.xlu0 %1124 }
 0x2bc   : > { %1680 = vlog2.f32 %v1123_v6 }
 0x2bd   : > { %v1176_v7 = vsub.f32 %v2093_v36, %v1145_v63  ;;  %1682 = vlog2.f32 %v1125_v41 }
 0x2be   : > { %v1673_v22 = vpop.eup %1672 }
 0x2bf   : > { %v1675_v23 = vpop.eup %1674  ;;  %1192 = vst [vmem:[%s1926_s5] sm:$0xff] %v1176_v7  ;;  %v1147_v42 = vmul.f32 0.6931472, %v1673_v22  ;;  %v1127_v31 = vpop.xlane.xlu1 %1126 }
 0x2c0   : > { %v1129_v45 = vpop.xlane.xlu0 %1128  ;;  %v1149_v46 = vmul.f32 0.6931472, %v1675_v23  ;;  %1684 = vlog2.f32 %v1127_v31 }
 0x2c1   : > { %v1177_v33 = vsub.f32 %v2099_v40, %v1147_v42  ;;  %1686 = vlog2.f32 %v1129_v45 }
 0x2c2   : > { %v1677_v47 = vpop.eup %1676  ;;  %v1178_v49 = vsub.f32 %v2095_v39, %v1149_v46 }
 0x2c3   : > { %v1679_v50 = vpop.eup %1678  ;;  %1193 = vst [vmem:[%s1926_s5 + $0x8] sm:$0xff] %v1177_v33  ;;  %v1151_v36 = vmul.f32 0.6931472, %v1677_v47  ;;  %v1131_v54 = vpop.xlane.xlu1 %1130 }
 0x2c4   : > { %v1133_v55 = vpop.xlane.xlu0 %1132  ;;  %1194 = vst [vmem:[%s1926_s5 + $0x10] sm:$0xff] %v1178_v49  ;;  %v1153_v56 = vmul.f32 0.6931472, %v1679_v50  ;;  %1688 = vlog2.f32 %v1131_v54 }
 0x2c5   : > { %v1179_v57 = vsub.f32 %v2101_v59, %v1151_v36  ;;  %1690 = vlog2.f32 %v1133_v55 }
 0x2c6   : > { %v1681_v58 = vpop.eup %1680  ;;  %v1180_v40 = vsub.f32 %v2105_v13, %v1153_v56 }
 0x2c7   : > { %v1683_v60 = vpop.eup %1682  ;;  %1195 = vst [vmem:[%s1926_s5 + $0x18] sm:$0xff] %v1179_v57  ;;  %v1155_v39 = vmul.f32 0.6931472, %v1681_v58  ;;  %v1135_v0 = vpop.xlane.xlu1 %1134 }
 0x2c8   : > { %v1137_v1 = vpop.xlane.xlu0 %1136  ;;  %1196 = vst [vmem:[%s1926_s5 + $0x20] sm:$0xff] %v1180_v40  ;;  %v1157_v2 = vmul.f32 0.6931472, %v1683_v60  ;;  %1692 = vlog2.f32 %v1135_v0 }
 0x2c9   : > { %v1181_v3 = vsub.f32 %v2107_v15, %v1155_v39  ;;  %1694 = vlog2.f32 %v1137_v1 }
 0x2ca   : > { %v1685_v4 = vpop.eup %1684  ;;  %v1182_v59 = vsub.f32 %v2111_v43, %v1157_v2 }
 0x2cb   : > { %v1687_v5 = vpop.eup %1686  ;;  %1197 = vst [vmem:[%s1926_s5 + $0x28] sm:$0xff] %v1181_v3  ;;  %v1159_v13 = vmul.f32 0.6931472, %v1685_v4  ;;  %v1139_v10 = vpop.xlane.xlu1 %1138 }
 0x2cc   : > { %v1141_v11 = vpop.xlane.xlu0 %1140  ;;  %1198 = vst [vmem:[%s1926_s5 + $0x30] sm:$0xff] %v1182_v59  ;;  %v1161_v12 = vmul.f32 0.6931472, %v1687_v5  ;;  %1696 = vlog2.f32 %v1139_v10 }
 0x2cd   : > { %v1183_v14 = vsub.f32 %v2113_v44, %v1159_v13  ;;  %1698 = vlog2.f32 %v1141_v11 }
 0x2ce   : > { %v1689_v15 = vpop.eup %1688  ;;  %v1184_v16 = vsub.f32 %v2117_v52, %v1161_v12 }
 0x2cf   : > { %v1691_v17 = vpop.eup %1690  ;;  %1199 = vst [vmem:[%s1926_s5 + $0x38] sm:$0xff] %v1183_v14  ;;  %v1163_v43 = vmul.f32 0.6931472, %v1689_v15  ;;  %v1143_v20 = vpop.xlane.xlu1 %1142 }
 0x2d0   : > { %1200 = vst [vmem:[%s1926_s5 + $0x40] sm:$0xff] %v1184_v16  ;;  %v1165_v21 = vmul.f32 0.6931472, %v1691_v17  ;;  %1700 = vlog2.f32 %v1143_v20 }
 0x2d1   : > { %v1185_v25 = vsub.f32 %v2119_v53, %v1163_v43 }
 0x2d2   : > { %v1693_v26 = vpop.eup %1692  ;;  %v1186_v28 = vsub.f32 %v2124_v61, %v1165_v21 }
 0x2d3   : > { %v1695_v44 = vpop.eup %1694  ;;  %1201 = vst [vmem:[%s1926_s5 + $0x48] sm:$0xff] %v1185_v25  ;;  %v1167_v29 = vmul.f32 0.6931472, %v1693_v26 }
 0x2d4   : > { %1202 = vst [vmem:[%s1926_s5 + $0x50] sm:$0xff] %v1186_v28  ;;  %v1169_v52 = vmul.f32 0.6931472, %v1695_v44 }
 0x2d5   : > { %v1187_v30 = vsub.f32 %v2127_v62, %v1167_v29 }
 0x2d6   : > { %v1697_v24 = vpop.eup %1696  ;;  %v1188_v27 = vsub.f32 %v2132_v8, %v1169_v52 }
 0x2d7   : > { %v1699_v35 = vpop.eup %1698  ;;  %1203 = vst [vmem:[%s1926_s5 + $0x58] sm:$0xff] %v1187_v30  ;;  %v1171_v32 = vmul.f32 0.6931472, %v1697_v24 }
 0x2d8   : > { %1204 = vst [vmem:[%s1926_s5 + $0x60] sm:$0xff] %v1188_v27  ;;  %v1173_v53 = vmul.f32 0.6931472, %v1699_v35 }
 0x2d9   : > { %v1189_v61 = vsub.f32 %v2135_v9, %v1171_v32 }
 0x2da   : > { %v1701_v34 = vpop.eup %1700  ;;  %v1190_v48 = vsub.f32 %v2140_v18, %v1173_v53 }
 0x2db   : > { %1205 = vst [vmem:[%s1926_s5 + $0x68] sm:$0xff] %v1189_v61  ;;  %v1175_v51 = vmul.f32 0.6931472, %v1701_v34 }
 0x2dc   : > { %1206 = vst [vmem:[%s1926_s5 + $0x70] sm:$0xff] %v1190_v48 }
 0x2dd   : > { %v1191_v37 = vsub.f32 %v2143_v19, %v1175_v51 }
 0x2df   : > { %1207 = vst [vmem:[%s1926_s5 + $0x78] sm:$0xff] %v1191_v37 }
 0x2e0 PF: > { %s13_s18 = sadd.s32 1, %s1756_s18   ;;  %s2204_s12 = smov %s1736_s13 }
 0x2e1   : > { %p10_p1 = scmp.ge.s32.totalorder %s13_s18, 6   ;;  %s2205_s13 = smov %s1829_s25 }
 0x2e2   : > { %s2206_s14 = smov %s1748_s16  ;;  %s2207_s15 = smov %s1752_s17 }
 0x2e3   : > { %s2208_s16 = smov %s2211_s19  ;;  %s2209_s17 = smov %s2215_s20 }
 0x2e4   :  { %12 = sbr.rel (!%p10_p1) target bundleno = 4 (0x4), region = 117 }

</bundles_post_ra>
